<compile_context>
chip_gen: v5e
topology: v5e:2x2
jax: 0.10.0
libtpu: 0.0.40
codegen_flags: <defaults>
</compile_context>

<pallas_src>
import functools

import jax
import jax.numpy as jnp
from jax import lax
from jax.experimental import pallas as pl
from jax.experimental.pallas import tpu as pltpu


def _omp1_kernel(x_ref, d_ref, dt_ref, ginv_ref,
                 q_ref, idx_ref, gamma_ref, ssd_ref):
    """One grid step: a tile of TL flattened pixel vectors.

    x_ref:     (TL, dim)       input rows
    d_ref:     (dim, n_embed)  dictionary (resident, full)
    dt_ref:    (n_embed, dim)  pre-transposed dictionary (resident, full)
    ginv_ref:  (1, n_embed)    precomputed 1 / ||d_k||^2 (0 where ||d_k||=0)
    q_ref:     (TL, dim)       reconstruction  code @ D^T
    idx_ref:   (TL, 1) int32   selected atom index per row
    gamma_ref: (TL, 1) f32     the single nonzero coefficient per row
    ssd_ref:   (8, dim) f32    per-tile partial sums of (q - x)^2 (row 0)
    """
    x = x_ref[...]                               # (TL, dim) f32
    d = d_ref[...]                               # (dim, n_embed) f32
    d_t = dt_ref[...]                            # (n_embed, dim) f32
    g_inv = ginv_ref[...]                        # (1, n_embed) f32

    dim = x.shape[-1]
    n_embed = d.shape[-1]

    # Correlations alpha = x @ D -> (TL, n_embed): natural MXU layout.
    alpha = jnp.dot(x, d, preferred_element_type=jnp.float32)
    abs_alpha = jnp.abs(alpha)

    # argmax over the atom axis (first index on ties): max + masked-iota-min.
    # (A packed single-reduction key was considered but rejected to keep exact
    #  tie behavior.)
    iota_row = lax.broadcasted_iota(jnp.int32, (1, n_embed), 1)   # (1, n_embed)
    max_val = jnp.max(abs_alpha, axis=-1, keepdims=True)          # (TL, 1)
    is_max = abs_alpha == max_val
    sel_idx = jnp.min(jnp.where(is_max, iota_row, n_embed),
                      axis=-1, keepdims=True)                     # (TL, 1) int32
    onehot = iota_row == sel_idx                                  # (TL, n_embed)

    # Single-atom least-squares coefficient; dense code stays in vregs only.
    code = jnp.where(onehot, alpha * g_inv, 0.0)                  # (TL, n_embed)

    # Reconstruction with the pre-transposed dictionary: natural MXU layout,
    # no in-kernel transpose of D.
    q = jnp.dot(code, d_t, preferred_element_type=jnp.float32)    # (TL, dim)
    q_ref[...] = q
    idx_ref[...] = sel_idx

    # gamma = row-sum of the one-hot code, done on the MXU (ones RHS) rather
    # than a third XLU lane reduction.
    ones_col = jnp.ones((n_embed, 1), jnp.float32)
    gamma_ref[...] = jnp.dot(code, ones_col,
                             preferred_element_type=jnp.float32)  # (TL, 1)

    # Fused MSE partial: per-column sums of (q - x)^2 for this tile, placed in
    # row 0 of an (8, dim) stats tile; the wrapper finishes the reduction on a
    # tiny array instead of re-reading q and x from HBM.
    diff = q - x
    col_ssd = jnp.sum(diff * diff, axis=0, keepdims=True)         # (1, dim)
    sub_iota = lax.broadcasted_iota(jnp.int32, (8, dim), 0)
    ssd_ref[...] = jnp.where(sub_iota == 0, col_ssd, 0.0)


def _vmem_capacity_bytes():
    """Best-effort physical VMEM size; conservative 64 MiB fallback."""
    try:
        info = pltpu.get_tpu_info()
        for name in ("vmem_capacity_bytes", "vmem_size_bytes", "vmem_bytes"):
            v = getattr(info, name, None)
            if v:
                return int(v)
    except Exception:
        pass
    return 64 << 20


def _pick_tile_l(L, cap_rows, requested=1024):
    """Pick the row-tile size.

    Preference order: a multiple-of-8 divisor of L (no padding copy), as large
    as the VMEM budget allows, softly preferring an even number of grid steps
    (v7x has two TensorCores).  Falls back to a single full-extent tile, then
    to a padded tile.
    """
    t_max = min(requested, cap_rows)
    cands = [t for t in range(8, min(t_max, L) + 1, 8) if L % t == 0]
    if cands:
        best = max(cands)
        even = [t for t in cands if (L // t) % 2 == 0 and 2 * t >= best]
        return max(even) if even else best
    if L <= t_max:
        return L                          # single full-extent tile (legal)
    return max(8, (t_max // 8) * 8)       # padded tail (rare)


def _omp1_pallas(flat_x, dictionary):
    """flat_x: (L, dim) f32, dictionary: (dim, n_embed) f32.

    Returns (quantize_flat (L, dim), sel (L,) int32, gamma (L,) f32,
             ssd_partials) where sum(ssd_partials) == sum((q - x)^2).
    """
    L, dim = flat_x.shape
    dim_d, n_embed = dictionary.shape
    assert dim == dim_d

    d32 = dictionary.astype(jnp.float32)
    d_t = jnp.transpose(d32)                                    # (n_embed, dim)
    g = jnp.sum(d32 * d32, axis=0, keepdims=True)               # (1, n_embed)
    g_inv = jnp.where(g > 0.0, 1.0 / g, 0.0)

    # --- generation-aware VMEM budgeting (temporaries included) ---
    cap = _vmem_capacity_bytes()
    if cap <= (64 << 20):            # v7x-class: 64 MiB physical -> headroom
        tile_budget, limit_cap = 26 << 20, 52 << 20
    else:                            # v5e / v6e: 128 MiB physical
        tile_budget, limit_cap = 88 << 20, 112 << 20

    resident = 4 * (2 * dim * n_embed + n_embed)        # D, D^T, g_inv (f32)
    io_row = 2 * 4 * (2 * dim + 2)                      # double-buffered x,q,idx,gamma
    tmp_row = 4 * (6 * n_embed + 4 * dim)               # live f32 body temporaries
    row_bytes = io_row + tmp_row
    avail = max(tile_budget - 2 * resident, 8 * row_bytes)
    cap_rows = max(8, (avail // row_bytes) // 8 * 8)

    tile_l = _pick_tile_l(L, cap_rows)
    grid_n = pl.cdiv(L, tile_l)
    L_pad = grid_n * tile_l
    if L_pad != L:                                      # rare: divisor not found
        flat_x = jnp.pad(flat_x, ((0, L_pad - L), (0, 0)))

    need = (tile_l * (io_row + tmp_row) + 2 * resident + 2 * 4 * 8 * dim)
    vmem_limit = int(min(max(need + (need >> 1) + (4 << 20), 32 << 20),
                         limit_cap))

    out_shape = (
        jax.ShapeDtypeStruct((L_pad, dim), jnp.float32),        # q = code @ D^T
        jax.ShapeDtypeStruct((L_pad, 1), jnp.int32),            # selected atom
        jax.ShapeDtypeStruct((L_pad, 1), jnp.float32),          # coefficient
        jax.ShapeDtypeStruct((grid_n * 8, dim), jnp.float32),   # MSE partials
    )
    grid_spec = pltpu.PrefetchScalarGridSpec(
        num_scalar_prefetch=0,
        grid=(grid_n,),
        in_specs=[
            pl.BlockSpec((tile_l, dim), lambda i: (i, 0)),
            pl.BlockSpec((dim, n_embed), lambda i: (0, 0)),
            pl.BlockSpec((n_embed, dim), lambda i: (0, 0)),
            pl.BlockSpec((1, n_embed), lambda i: (0, 0)),
        ],
        out_specs=[
            pl.BlockSpec((tile_l, dim), lambda i: (i, 0)),
            pl.BlockSpec((tile_l, 1), lambda i: (i, 0)),
            pl.BlockSpec((tile_l, 1), lambda i: (i, 0)),
            pl.BlockSpec((8, dim), lambda i: (i, 0)),
        ],
    )
    q, sel, gamma, ssd = pl.pallas_call(
        _omp1_kernel,
        out_shape=out_shape,
        grid_spec=grid_spec,
        compiler_params=pltpu.CompilerParams(
            dimension_semantics=("parallel",),
            vmem_limit_bytes=vmem_limit),
    )(flat_x, d32, d_t, g_inv)

    return q[:L], sel[:L, 0], gamma[:L, 0], ssd


@functools.partial(jax.jit, static_argnames=("num_nonzero",))
def omp_quantize_forward(x_nchw, dictionary, num_nonzero=1):
    """Forward pass of OMPQuantize (default kwargs) on NCHW float input."""
    if num_nonzero != 1:
        # TODO(synk): num_nonzero > 1 needs iterative (Cholesky-update) OMP.
        raise NotImplementedError("Only num_nonzero=1 is supported.")

    N, C, H, W = x_nchw.shape
    dim, n_embed = dictionary.shape
    assert C == dim

    # NCHW -> NHWC -> (L, dim)
    permuted = jnp.transpose(x_nchw, (0, 2, 3, 1)).astype(jnp.float32)
    flatten = permuted.reshape(-1, dim)                          # (L, dim)
    L = N * H * W

    # --- hot path in Pallas ---
    q_flat, sel, gamma, ssd_parts = _omp1_pallas(flatten, dictionary)

    # Straight-through value: the forward output equals the reconstruction.
    # TODO(synk): no custom VJP is defined for the Pallas kernel, so the
    #             straight-through / backward_dict detach patterns of the
    #             PyTorch module are reproduced in forward value only.
    quantize_nhwc = q_flat.reshape(N, H, W, dim)
    quantize_out = jnp.transpose(quantize_nhwc, (0, 3, 1, 2)).astype(x_nchw.dtype)

    # Rebuild the dense sparse code (`ids`) directly in its final NCHW-style
    # layout (N, n_embed, H, W) from the tiny index + coefficient streams —
    # the dense (L, n_embed) code is never written by the kernel nor relaid.
    sel_nhw = sel.reshape(N, 1, H, W)
    gam_nhw = gamma.reshape(N, 1, H, W)
    k_iota = jnp.arange(n_embed, dtype=jnp.int32).reshape(1, n_embed, 1, 1)
    ids_out = jnp.where(k_iota == sel_nhw, gam_nhw, 0.0)         # (N, n_embed, H, W)

    # --- statistics (fused MSE partials + tiny per-row gamma stream) ---
    mse = jnp.sum(ssd_parts) / jnp.float32(L * dim)
    quantization_diff_for_encoder = mse
    quantization_diff_for_dictionary = lax.stop_gradient(mse)

    nonzero = (gamma != 0.0).astype(jnp.float32)                 # per-row L0 (<=1)
    nnz = jnp.sum(nonzero)
    num_quantization_steps = jnp.asarray(float(num_nonzero), jnp.float32)
    mean_D = jnp.mean(jnp.abs(dictionary))
    mean_Z = jnp.sum(jnp.abs(gamma)) / jnp.float32(L * n_embed)
    norm_Z = nnz / jnp.float32(L)
    topk_num = max(1, int(L * 0.01))
    # Exact replacement of topk(norm_0, k).values.min() for a {0,1} vector.
    top_percentile = (nnz >= jnp.float32(topk_num)).astype(jnp.float32)
    num_zeros = jnp.float32(L) - nnz

    return (quantize_out,
            [quantization_diff_for_encoder, quantization_diff_for_dictionary],
            ids_out,
            num_quantization_steps,
            mean_D, mean_Z, norm_Z, top_percentile, num_zeros)


if __name__ == "__main__":
    # Small shapes consistent with the module: dim = channels.
    N, dim, H, W = 2, 4, 16, 16
    n_embed = 32

    key = jax.random.PRNGKey(0)
    kx, kd = jax.random.split(key)
    x = jax.random.normal(kx, (N, dim, H, W), dtype=jnp.float32)
    dictionary = jax.random.normal(kd, (dim, n_embed), dtype=jnp.float32)

    outs = omp_quantize_forward(x, dictionary, num_nonzero=1)
    outs = jax.block_until_ready(outs)

    quantize_out, diffs, ids_out = outs[0], outs[1], outs[2]
    assert quantize_out.shape == (N, dim, H, W)
    assert ids_out.shape == (N, n_embed, H, W)
    assert all(bool(jnp.isfinite(d)) for d in diffs)

    # Sanity: each pixel's code has at most one nonzero entry (num_nonzero=1).
    l0 = jnp.sum((ids_out != 0).astype(jnp.int32), axis=1)
    assert int(jnp.max(l0)) <= 1

    print("KERNEL_OK")
</pallas_src>

<mosaic_0001>
module attributes {stable_mosaic.version = 11 : i64} {
  func.func @_omp1_kernel(%arg0: i32, %arg1: memref<256x4xf32, #tpu.memory_space<vmem>>, %arg2: memref<4x32xf32, #tpu.memory_space<vmem>>, %arg3: memref<32x4xf32, #tpu.memory_space<vmem>>, %arg4: memref<1x32xf32, #tpu.memory_space<vmem>>, %arg5: memref<256x4xf32, #tpu.memory_space<vmem>>, %arg6: memref<256x1xi32, #tpu.memory_space<vmem>>, %arg7: memref<256x1xf32, #tpu.memory_space<vmem>>, %arg8: memref<8x4xf32, #tpu.memory_space<vmem>>) attributes {dimension_semantics = [#tpu.dimension_semantics<parallel>], iteration_bounds = array<i64: 2>, scalar_prefetch = 0 : i64, scratch_operands = 0 : i64, tpu.core_type = #tpu.core_type<tc>, window_params = [{transform_indices = @transform_0, window_bounds = array<i64: 256, 4>}, {pipeline_mode = #tpu.pipeline_mode<synchronous>, transform_indices = @transform_1, window_bounds = array<i64: 4, 32>}, {pipeline_mode = #tpu.pipeline_mode<synchronous>, transform_indices = @transform_2, window_bounds = array<i64: 32, 4>}, {pipeline_mode = #tpu.pipeline_mode<synchronous>, transform_indices = @transform_3, window_bounds = array<i64: 1, 32>}, {transform_indices = @transform_4, window_bounds = array<i64: 256, 4>}, {transform_indices = @transform_5, window_bounds = array<i64: 256, 1>}, {transform_indices = @transform_6, window_bounds = array<i64: 256, 1>}, {transform_indices = @transform_7, window_bounds = array<i64: 8, 4>}]} {
    %c0 = arith.constant 0 : index
    %c0_0 = arith.constant 0 : index
    %0 = vector.load %arg1[%c0, %c0_0] : memref<256x4xf32, #tpu.memory_space<vmem>>, vector<256x4xf32>
    %c0_1 = arith.constant 0 : index
    %c0_2 = arith.constant 0 : index
    %1 = vector.load %arg2[%c0_1, %c0_2] : memref<4x32xf32, #tpu.memory_space<vmem>>, vector<4x32xf32>
    %c0_3 = arith.constant 0 : index
    %c0_4 = arith.constant 0 : index
    %2 = vector.load %arg3[%c0_3, %c0_4] : memref<32x4xf32, #tpu.memory_space<vmem>>, vector<32x4xf32>
    %c0_5 = arith.constant 0 : index
    %c0_6 = arith.constant 0 : index
    %3 = vector.load %arg4[%c0_5, %c0_6] : memref<1x32xf32, #tpu.memory_space<vmem>>, vector<1x32xf32>
    %cst = arith.constant dense<0.000000e+00> : vector<256x32xf32>
    %4 = tpu.matmul %0, %1, %cst {dimension_numbers = #tpu.dot_dimension_numbers<[1], [0], [0], [1], [0, 0, 1, 1], [], []>} : vector<256x4xf32>, vector<4x32xf32>, vector<256x32xf32> -> vector<256x32xf32>
    %5 = math.absf %4 : vector<256x32xf32>
    %6 = tpu.iota {dimensions = array<i32: 1>} : vector<1x32xi32>
    %cst_7 = arith.constant dense<0xFF800000> : vector<256xf32>
    %7 = vector.multi_reduction <maximumf>, %5, %cst_7 [1] : vector<256x32xf32> to vector<256xf32>
    %8 = vector.shape_cast %7 : vector<256xf32> to vector<256x1xf32>
    %9 = vector.broadcast %8 : vector<256x1xf32> to vector<256x32xf32>
    %10 = arith.cmpf oeq, %5, %9 : vector<256x32xf32>
    %c32_i32 = arith.constant 32 : i32
    %11 = vector.shape_cast %6 : vector<1x32xi32> to vector<1x32xi32>
    %12 = vector.broadcast %11 : vector<1x32xi32> to vector<256x32xi32>
    %13 = vector.broadcast %c32_i32 : i32 to vector<256x32xi32>
    %14 = arith.select %10, %12, %13 : vector<256x32xi1>, vector<256x32xi32>
    %cst_8 = arith.constant dense<2147483647> : vector<256xi32>
    %15 = vector.multi_reduction <minsi>, %14, %cst_8 [1] : vector<256x32xi32> to vector<256xi32>
    %16 = vector.shape_cast %15 : vector<256xi32> to vector<256x1xi32>
    %17 = vector.broadcast %6 : vector<1x32xi32> to vector<256x32xi32>
    %18 = vector.broadcast %16 : vector<256x1xi32> to vector<256x32xi32>
    %19 = arith.cmpi eq, %17, %18 : vector<256x32xi32>
    %20 = vector.broadcast %3 : vector<1x32xf32> to vector<256x32xf32>
    %21 = arith.mulf %4, %20 : vector<256x32xf32>
    %cst_9 = arith.constant 0.000000e+00 : f32
    %22 = vector.broadcast %cst_9 : f32 to vector<256x32xf32>
    %23 = arith.select %19, %21, %22 : vector<256x32xi1>, vector<256x32xf32>
    %cst_10 = arith.constant dense<0.000000e+00> : vector<256x4xf32>
    %24 = tpu.matmul %23, %2, %cst_10 {dimension_numbers = #tpu.dot_dimension_numbers<[1], [0], [0], [1], [0, 0, 1, 1], [], []>} : vector<256x32xf32>, vector<32x4xf32>, vector<256x4xf32> -> vector<256x4xf32>
    %c0_11 = arith.constant 0 : index
    %c0_12 = arith.constant 0 : index
    %25 = vector.load %arg5[%c0_11, %c0_12] : memref<256x4xf32, #tpu.memory_space<vmem>>, vector<256x4xf32>
    tpu.vector_store %arg5[%c0_11, %c0_12], %24 {strides = array<i32>} : memref<256x4xf32, #tpu.memory_space<vmem>>, vector<256x4xf32>,
    %c0_13 = arith.constant 0 : index
    %c0_14 = arith.constant 0 : index
    %26 = vector.load %arg6[%c0_13, %c0_14] : memref<256x1xi32, #tpu.memory_space<vmem>>, vector<256x1xi32>
    tpu.vector_store %arg6[%c0_13, %c0_14], %16 {strides = array<i32>} : memref<256x1xi32, #tpu.memory_space<vmem>>, vector<256x1xi32>,
    %cst_15 = arith.constant 1.000000e+00 : f32
    %27 = vector.broadcast %cst_15 : f32 to vector<32x1xf32>
    %cst_16 = arith.constant dense<0.000000e+00> : vector<256x1xf32>
    %28 = tpu.matmul %23, %27, %cst_16 {dimension_numbers = #tpu.dot_dimension_numbers<[1], [0], [0], [1], [0, 0, 1, 1], [], []>} : vector<256x32xf32>, vector<32x1xf32>, vector<256x1xf32> -> vector<256x1xf32>
    %c0_17 = arith.constant 0 : index
    %c0_18 = arith.constant 0 : index
    %29 = vector.load %arg7[%c0_17, %c0_18] : memref<256x1xf32, #tpu.memory_space<vmem>>, vector<256x1xf32>
    tpu.vector_store %arg7[%c0_17, %c0_18], %28 {strides = array<i32>} : memref<256x1xf32, #tpu.memory_space<vmem>>, vector<256x1xf32>,
    %30 = arith.subf %24, %0 : vector<256x4xf32>
    %31 = arith.mulf %30, %30 : vector<256x4xf32>
    %cst_19 = arith.constant dense<0.000000e+00> : vector<4xf32>
    %32 = vector.multi_reduction <add>, %31, %cst_19 [0] : vector<256x4xf32> to vector<4xf32>
    %33 = vector.shape_cast %32 : vector<4xf32> to vector<1x4xf32>
    %34 = tpu.iota {dimensions = array<i32: 0>} : vector<8x4xi32>
    %c0_i32 = arith.constant 0 : i32
    %35 = vector.broadcast %c0_i32 : i32 to vector<8x4xi32>
    %36 = arith.cmpi eq, %34, %35 : vector<8x4xi32>
    %cst_20 = arith.constant 0.000000e+00 : f32
    %37 = vector.shape_cast %33 : vector<1x4xf32> to vector<1x4xf32>
    %38 = vector.broadcast %37 : vector<1x4xf32> to vector<8x4xf32>
    %39 = vector.broadcast %cst_20 : f32 to vector<8x4xf32>
    %40 = arith.select %36, %38, %39 : vector<8x4xi1>, vector<8x4xf32>
    %c0_21 = arith.constant 0 : index
    %c0_22 = arith.constant 0 : index
    %41 = vector.load %arg8[%c0_21, %c0_22] : memref<8x4xf32, #tpu.memory_space<vmem>>, vector<8x4xf32>
    tpu.vector_store %arg8[%c0_21, %c0_22], %40 {strides = array<i32>} : memref<8x4xf32, #tpu.memory_space<vmem>>, vector<8x4xf32>,
    return
  }
  func.func @transform_0(%arg0: i32) -> (i32, i32) {
    %c0_i32 = arith.constant 0 : i32
    %c0_i32_0 = arith.constant 0 : i32
    return %arg0, %c0_i32 : i32, i32
  }
  func.func @transform_1(%arg0: i32) -> (i32, i32) {
    %c0_i32 = arith.constant 0 : i32
    %c0_i32_0 = arith.constant 0 : i32
    %c0_i32_1 = arith.constant 0 : i32
    return %c0_i32, %c0_i32_0 : i32, i32
  }
  func.func @transform_2(%arg0: i32) -> (i32, i32) {
    %c0_i32 = arith.constant 0 : i32
    %c0_i32_0 = arith.constant 0 : i32
    %c0_i32_1 = arith.constant 0 : i32
    return %c0_i32, %c0_i32_0 : i32, i32
  }
  func.func @transform_3(%arg0: i32) -> (i32, i32) {
    %c0_i32 = arith.constant 0 : i32
    %c0_i32_0 = arith.constant 0 : i32
    %c0_i32_1 = arith.constant 0 : i32
    return %c0_i32, %c0_i32_0 : i32, i32
  }
  func.func @transform_4(%arg0: i32) -> (i32, i32) {
    %c0_i32 = arith.constant 0 : i32
    %c0_i32_0 = arith.constant 0 : i32
    return %arg0, %c0_i32 : i32, i32
  }
  func.func @transform_5(%arg0: i32) -> (i32, i32) {
    %c0_i32 = arith.constant 0 : i32
    %c0_i32_0 = arith.constant 0 : i32
    return %arg0, %c0_i32 : i32, i32
  }
  func.func @transform_6(%arg0: i32) -> (i32, i32) {
    %c0_i32 = arith.constant 0 : i32
    %c0_i32_0 = arith.constant 0 : i32
    return %arg0, %c0_i32 : i32, i32
  }
  func.func @transform_7(%arg0: i32) -> (i32, i32) {
    %c0_i32 = arith.constant 0 : i32
    %c0_i32_0 = arith.constant 0 : i32
    return %arg0, %c0_i32 : i32, i32
  }
}

</mosaic_0001>

<bundles_post_ra>
// kernel: eq.11
= control target key start
LH: loop header
LB: loop body
LE: loop exit
PB: predicated region body
PF: predicated region fallthrough
CT: control target
= control target key end

     0   :  { %s66_s8 = smov 80   ;;  %s67_s9 = smov 48   ;;  %vm7_vm0 = vcmask 130048   ;;  %s117_s0 = inlined_call_operand.vmem [shape: s32[512], index: 0, kind: input, shape index: {}]   ;;  %s118_s1 = inlined_call_operand.vmem [shape: s32[2,16,16], index: 1, kind: output, shape index: {}]  }
   0x1   :  { %v4_v0 = vld [vmem:[%s117_s0] sm:$0xf]  ;;  %s65_s0 = smov 112   ;;  %s68_s10 = smov 96  }
   0x2   :  { %5 = vst [vmem:[#allocation0] sm:$0xf] %v4_v0  ;;  %s69_s11 = smov 64   ;;  %s70_s12 = smov 32  }
   0x3   :  { %s71_s13 = smov 16  }
   0x9   :  { %v9_v1 = vld [vmem:[#allocation0] sm:$0xf]  }
   0xa   :  { %v21_v2 = vld [vmem:[#allocation0] sm:$0xf]   ;;  %10 = vrot.lane.b32.xlu0 %v9_v1, %s65_s0 }
   0xb   :  { %22 = vrot.lane.b32.xlu1 %v21_v2, %s66_s8  ;;  %v33_v3 = vld [vmem:[#allocation0] sm:$0xf]  }
   0xc   :  { %34 = vrot.lane.b32.xlu2 %v33_v3, %s67_s9  ;;  %v15_v4 = vld [vmem:[#allocation0] sm:$0xf]  }
   0xd   :  { %v27_v5 = vld [vmem:[#allocation0] sm:$0xf]  }
   0xe   :  { %v39_v6 = vld [vmem:[#allocation0] sm:$0xf]  }
   0xf   :  { %v45_v7 = vld [vmem:[#allocation0] sm:$0xf]  }
  0x10   :  { %v6_v8 = vld [vmem:[#allocation0] sm:$0xf]  }
  0x11   :  { %8 = vst.msk [vmem:[%s118_s1] ss:$8 sm:$0xf] %vm7_vm0, %v6_v8  }
  0x12   :  { %16 = vrot.lane.b32.xlu0 %v15_v4, %s68_s10 }
  0x13   :  { %28 = vrot.lane.b32.xlu1 %v27_v5, %s69_s11 }
  0x14   :  { %40 = vrot.lane.b32.xlu2 %v39_v6, %s70_s12 }
  0x1a   :  { %46 = vrot.lane.b32.xlu0 %v45_v7, %s71_s13 }
  0x66   :  { %v35_v9 = vpop.permute.xlu2 %34  }
  0x67   :  { %55 = vst.msk [vmem:[%s118_s1 + $0x5] ss:$8 sm:$0xf] %vm7_vm0, %v35_v9  }
  0x6e   :  { %v41_v10 = vpop.permute.xlu2 %40  }
  0x6f   :  { %56 = vst.msk [vmem:[%s118_s1 + $0x6] ss:$8 sm:$0xf] %vm7_vm0, %v41_v10  }
  0x7c   :  { %v11_v11 = vpop.permute.xlu0 %10  }
  0x7d   :  { %v23_v12 = vpop.permute.xlu1 %22   ;;  %51 = vst.msk [vmem:[%s118_s1 + $0x1] ss:$8 sm:$0xf] %vm7_vm0, %v11_v11  }
  0x7e   :  { %53 = vst.msk [vmem:[%s118_s1 + $0x3] ss:$8 sm:$0xf] %vm7_vm0, %v23_v12  }
  0x84   :  { %v17_v13 = vpop.permute.xlu0 %16  }
  0x85   :  { %v29_v14 = vpop.permute.xlu1 %28   ;;  %52 = vst.msk [vmem:[%s118_s1 + $0x2] ss:$8 sm:$0xf] %vm7_vm0, %v17_v13  }
  0x86   :  { %54 = vst.msk [vmem:[%s118_s1 + $0x4] ss:$8 sm:$0xf] %vm7_vm0, %v29_v14  }
  0x8c   :  { %v47_v15 = vpop.permute.xlu0 %46  }
  0x8d   :  { %57 = vst.msk [vmem:[%s118_s1 + $0x7] ss:$8 sm:$0xf] %vm7_vm0, %v47_v15  }

// kernel: omp_quantize_forward.1
= control target key start
LH: loop header
LB: loop body
LE: loop exit
PB: predicated region body
PF: predicated region fallthrough
CT: control target
= control target key end

     0   :  { %s2271_s24 = smov 0   ;;  %s3655_s0 = inlined_call_operand.vmem [shape: f32[512,4], index: 0, kind: input, shape index: {}]   ;;  %s3656_s1 = inlined_call_operand.vmem [shape: f32[4,32], index: 1, kind: input, shape index: {}]   ;;  %s3657_s2 = inlined_call_operand.vmem [shape: f32[32,4], index: 2, kind: input, shape index: {}]   ;;  %s3658_s3 = inlined_call_operand.vmem [shape: f32[1,32], index: 3, kind: input, shape index: {}]   ;;  %s3659_s4 = inlined_call_operand.vmem [shape: f32[512,4], index: 4, kind: output, shape index: {0}]   ;;  %s3660_s5 = inlined_call_operand.vmem [shape: s32[512,1], index: 5, kind: output, shape index: {1}]   ;;  %s3661_s6 = inlined_call_operand.vmem [shape: f32[512,1], index: 6, kind: output, shape index: {2}]   ;;  %s3662_s7 = inlined_call_operand.vmem [shape: f32[16,4], index: 7, kind: output, shape index: {3}]  }
   0x1 LB: > { %s2277_s25 = sadd.s32 4294967295, %s2228_s24   ;;  %p2061_p0 = scmp.ge.s32.totalorder %s2228_s24, 1  ;;  %s2228_s24 = sphi %s2271_s24, %s18_s24  }
   0x2   : > { %p245_p1 = scmp.lt.s32.totalorder %s2228_s24, 3 }
   0x4   : > { %p246_p2 = pnand %p2061_p0, %p245_p1 }
   0x6   : > { %249 = sbr.rel (%p246_p2) target bundleno = 1053 (0x41d), region = 36 }
   0xb   : > { %v351_v0 = vld [vmem:[%s3656_s1] sm:$0xf]  ;;  %vm454_vm0 = vcmask 1043456   ;;  %s2062_s28 = sshll.u32 %s2277_s25, 5  ;;  %vm357_vm1 = vcmask 31744   ;;  %vm605_vm2 = vcmask 261120  }
   0xc   : > { %2071 = vmatpush.msk.msra.mxu0 %vm454_vm0, %v351_v0  ;;  %2170 = vmatpush.msk.msra.mxu3 %vm454_vm0, %v351_v0  ;;  %p292_p3 = scmp.lt.s32.totalorder %s2062_s28, 63  ;;  %p315_p4 = scmp.lt.s32.totalorder %s2277_s25, 1 }
   0xe   : > { %s3778_s28 = smov (!%p292_p3, %s2062_s28), 63  ;;  %s3780_s25 = smov (!%p315_p4, %s2277_s25), 1 }
   0xf   : > { %s2285_s29 = sshll.u32 %s3778_s28, 3 }
  0x10   : > { %s2291_s9 = scalar_lea.vmem %s3655_s0, %s2285_s29  ;;  %s2909_s22 = scalar_lea.vmem %s3660_s5, %s2285_s29 }
  0x11   : > { %v319_v1 = vld [vmem:[%s2291_s9] sm:$0xff]  ;;  %v344_v2 = vld [vmem:[%s2291_s9 + $0xc8] sm:$0xff]  ;;  %v345_v4 = vld [vmem:[%s2291_s9 + $0xd0] sm:$0xff]  ;;  %s3154_s27 = scalar_lea.vmem %s3659_s4, %s2285_s29  ;;  %s3169_s8 = scalar_lea.vmem %s3661_s6, %s2285_s29 }
  0x12   : > { %2072 = vmatmul.msk.f32.vlgmr.msra.gmra.mxu0 %vm357_vm1, %v319_v1  ;;  %2097 = vmatmul.msk.f32.vlgmr.msra.gmra.mxu3 %vm357_vm1, %v344_v2  ;;  %v320_v3 = vld [vmem:[%s2291_s9 + $0x8] sm:$0xff]  ;;  %v321_v5 = vld [vmem:[%s2291_s9 + $0x10] sm:$0xff]  ;;  %v346_v6 = vld [vmem:[%s2291_s9 + $0xd8] sm:$0xff] }
  0x13   : > { %v322_v7 = vld [vmem:[%s2291_s9 + $0x18] sm:$0xff]  ;;  %v323_v8 = vld [vmem:[%s2291_s9 + $0x20] sm:$0xff]  ;;  %v324_v9 = vld [vmem:[%s2291_s9 + $0x28] sm:$0xff] }
  0x14   : > { %v325_v10 = vld [vmem:[%s2291_s9 + $0x30] sm:$0xff]  ;;  %v326_v11 = vld [vmem:[%s2291_s9 + $0x38] sm:$0xff]  ;;  %v327_v12 = vld [vmem:[%s2291_s9 + $0x40] sm:$0xff] }
  0x15   : > { %v328_v13 = vld [vmem:[%s2291_s9 + $0x48] sm:$0xff]  ;;  %v329_v14 = vld [vmem:[%s2291_s9 + $0x50] sm:$0xff]  ;;  %v330_v15 = vld [vmem:[%s2291_s9 + $0x58] sm:$0xff] }
  0x16   : > { %v331_v16 = vld [vmem:[%s2291_s9 + $0x60] sm:$0xff]  ;;  %v332_v18 = vld [vmem:[%s2291_s9 + $0x68] sm:$0xff]  ;;  %v333_v19 = vld [vmem:[%s2291_s9 + $0x70] sm:$0xff] }
  0x17   : > { %v347_v17 = vld [vmem:[%s2291_s9 + $0xe0] sm:$0xff]  ;;  %v334_v20 = vld [vmem:[%s2291_s9 + $0x78] sm:$0xff]  ;;  %v336_v28 = vld [vmem:[%s2291_s9 + $0x88] sm:$0xff] }
  0x18   : > { %v335_v22 = vld [vmem:[%s2291_s9 + $0x80] sm:$0xff]  ;;  %v337_v35 = vld [vmem:[%s2291_s9 + $0x90] sm:$0xff]  ;;  %v338_v42 = vld [vmem:[%s2291_s9 + $0x98] sm:$0xff] }
  0x19   : > { %v339_v46 = vld [vmem:[%s2291_s9 + $0xa0] sm:$0xff]  ;;  %v348_v50 = vld [vmem:[%s2291_s9 + $0xe8] sm:$0xff]  ;;  %v349_v55 = vld [vmem:[%s2291_s9 + $0xf0] sm:$0xff] }
  0x1a   : > { %2073 = vmatmul.msk.f32.gmra.mxu0 %vm357_vm1, %v320_v3  ;;  %2098 = vmatmul.msk.f32.gmra.mxu3 %vm357_vm1, %v345_v4  ;;  %v340_v52 = vld [vmem:[%s2291_s9 + $0xa8] sm:$0xff]  ;;  %v341_v57 = vld [vmem:[%s2291_s9 + $0xb0] sm:$0xff]  ;;  %v342_v61 = vld [vmem:[%s2291_s9 + $0xb8] sm:$0xff] }
  0x1b   : > { %v343_v1 = vld [vmem:[%s2291_s9 + $0xc0] sm:$0xff] }
  0x22   : > { %2074 = vmatmul.msk.f32.gmra.mxu0 %vm357_vm1, %v321_v5  ;;  %2099 = vmatmul.msk.f32.gmra.mxu3 %vm357_vm1, %v346_v6 }
  0x2a   : > { %2075 = vmatmul.msk.f32.gmra.mxu0 %vm357_vm1, %v322_v7  ;;  %2100 = vmatmul.msk.f32.gmra.mxu3 %vm357_vm1, %v347_v17 }
  0x32   : > { %2076 = vmatmul.msk.f32.gmra.mxu0 %vm357_vm1, %v323_v8  ;;  %2101 = vmatmul.msk.f32.gmra.mxu3 %vm357_vm1, %v348_v50 }
  0x3a   : > { %2077 = vmatmul.msk.f32.gmra.mxu0 %vm357_vm1, %v324_v9  ;;  %2102 = vmatmul.msk.f32.gmra.mxu3 %vm357_vm1, %v349_v55 }
  0x42   : > { %2078 = vmatmul.msk.f32.gmra.mxu0 %vm357_vm1, %v325_v10 }
  0x4a   : > { %2079 = vmatmul.msk.f32.gmra.mxu0 %vm357_vm1, %v326_v11 }
  0x52   : > { %2080 = vmatmul.msk.f32.gmra.mxu0 %vm357_vm1, %v327_v12 }
  0x5a   : > { %2081 = vmatmul.msk.f32.gmra.mxu0 %vm357_vm1, %v328_v13 }
  0x62   : > { %2082 = vmatmul.msk.f32.gmra.mxu0 %vm357_vm1, %v329_v14 }
  0x6a   : > { %2083 = vmatmul.msk.f32.gmra.mxu0 %vm357_vm1, %v330_v15 }
  0x72   : > { %2084 = vmatmul.msk.f32.gmra.mxu0 %vm357_vm1, %v331_v16  ;;  %v350_v16 = vld [vmem:[%s2291_s9 + $0xf8] sm:$0xff] }
  0x73   : > { %2103 = vmatmul.msk.f32.gmra.mxu3 %vm357_vm1, %v350_v16 }
  0x7a   : > { %2085 = vmatmul.msk.f32.gmra.mxu0 %vm357_vm1, %v332_v18 }
  0x82   : > { %2086 = vmatmul.msk.f32.gmra.mxu0 %vm357_vm1, %v333_v19 }
  0x8a   : > { %2087 = vmatmul.msk.f32.gmra.mxu0 %vm357_vm1, %v334_v20 }
  0x8f   : > { %v2333_v21 = vpop.f32.mrf.mxu0 }
  0x90   : > { %v571_v23 = vand.u32 2147483647, %v2333_v21 }
  0x92   : > { %2088 = vmatmul.msk.f32.gmra.mxu0 %vm357_vm1, %v335_v22  ;;  %v606_v24 = vsel %vm605_vm2, %v571_v23, -inf }
  0x93   : > { %607 = vmax.xlane.f32.xlu0 %v606_v24  ;;  %v3663_v24 = vlaneseq }
  0x95   : > { %v2341_v25 = vpop.f32.mrf.mxu3 }
  0x96   : > { %3705 = vst [vmem:[#allocation2_spill] sm:$0xff] %v2341_v25  ;;  %v3669_v26 = vand.u32 2147483647, %v2341_v25 }
  0x97   : > { %v2344_v27 = vpop.f32.mrf.mxu0 }
  0x98   : > { %v572_v29 = vand.u32 2147483647, %v2344_v27  ;;  %v681_v30 = vsel %vm605_vm2, %v3669_v26, -inf }
  0x99   : > { %682 = vmax.xlane.f32.xlu2 %v681_v30  ;;  %v2466_v30 = vand.u32 127, %v3663_v24 }
  0x9a   : > { %v609_v31 = vsel %vm605_vm2, %v572_v29, -inf  ;;  %2089 = vmatmul.msk.f32.gmra.mxu0 %vm357_vm1, %v336_v28 }
  0x9b   : > { %610 = vmax.xlane.f32.xlu0 %v609_v31 }
  0x9d   : > { %v2355_v32 = vpop.f32.mrf.mxu3 }
  0x9e   : > { %3706 = vst [vmem:[#allocation3_spill] sm:$0xff] %v2355_v32  ;;  %v3670_v33 = vand.u32 2147483647, %v2355_v32 }
  0x9f   : > { %v2358_v34 = vpop.f32.mrf.mxu0 }
  0xa0   : > { %v684_v36 = vsel %vm605_vm2, %v3670_v33, -inf  ;;  %v573_v37 = vand.u32 2147483647, %v2358_v34 }
  0xa2   : > { %v612_v38 = vsel %vm605_vm2, %v573_v37, -inf  ;;  %2090 = vmatmul.msk.f32.gmra.mxu0 %vm357_vm1, %v337_v35 }
  0xa3   : > { %685 = vmax.xlane.f32.xlu0 %v684_v36  ;;  %613 = vmax.xlane.f32.xlu1 %v612_v38 }
  0xa5   : > { %v2369_v39 = vpop.f32.mrf.mxu3 }
  0xa6   : > { %3707 = vst [vmem:[#allocation4_spill] sm:$0xff] %v2369_v39  ;;  %v3667_v40 = vand.u32 2147483647, %v2369_v39 }
  0xa7   : > { %v2372_v41 = vpop.f32.mrf.mxu0 }
  0xa8   : > { %v687_v43 = vsel %vm605_vm2, %v3667_v40, -inf  ;;  %v574_v44 = vand.u32 2147483647, %v2372_v41 }
  0xaa   : > { %2091 = vmatmul.msk.f32.gmra.mxu0 %vm357_vm1, %v338_v42  ;;  %v615_v48 = vsel %vm605_vm2, %v574_v44, -inf }
  0xab   : > { %688 = vmax.xlane.f32.xlu1 %v687_v43 }
  0xaf   : > { %v2380_v45 = vpop.f32.mrf.mxu0 }
  0xb0   : > { %3708 = vst [vmem:[#allocation5_spill] sm:$0xff] %v2380_v45  ;;  %v575_v47 = vand.u32 2147483647, %v2380_v45 }
  0xb2   : > { %v618_v49 = vsel %vm605_vm2, %v575_v47, -inf  ;;  %2092 = vmatmul.msk.f32.gmra.mxu0 %vm357_vm1, %v339_v46 }
  0xb3   : > { %616 = vmax.xlane.f32.xlu1 %v615_v48  ;;  %619 = vmax.xlane.f32.xlu2 %v618_v49 }
  0xb7   : > { %v2392_v51 = vpop.f32.mrf.mxu0 }
  0xb8   : > { %3709 = vst [vmem:[#allocation6_spill] sm:$0xff] %v2392_v51  ;;  %v576_v53 = vand.u32 2147483647, %v2392_v51 }
  0xba   : > { %v621_v54 = vsel %vm605_vm2, %v576_v53, -inf  ;;  %2093 = vmatmul.msk.f32.gmra.mxu0 %vm357_vm1, %v340_v52 }
  0xbb   : > { %622 = vmax.xlane.f32.xlu2 %v621_v54 }
  0xbf   : > { %v2402_v56 = vpop.f32.mrf.mxu0 }
  0xc0   : > { %3710 = vst [vmem:[#allocation7_spill] sm:$0xff] %v2402_v56  ;;  %v577_v58 = vand.u32 2147483647, %v2402_v56 }
  0xc2   : > { %v624_v59 = vsel %vm605_vm2, %v577_v58, -inf  ;;  %2094 = vmatmul.msk.f32.gmra.mxu0 %vm357_vm1, %v341_v57 }
  0xc3   : > { %625 = vmax.xlane.f32.xlu1 %v624_v59  ;;  %v2499_v59 = vpop.f32.mrf.mxu3 }
  0xc4   : > { %3719 = vst [vmem:[#allocation16_spill] sm:$0xff] %v2499_v59 }
  0xc7   : > { %v2411_v60 = vpop.f32.mrf.mxu0 }
  0xc8   : > { %3711 = vst [vmem:[#allocation8_spill] sm:$0xff] %v2411_v60  ;;  %v578_v62 = vand.u32 2147483647, %v2411_v60 }
  0xca   : > { %v627_v63 = vsel %vm605_vm2, %v578_v62, -inf  ;;  %2095 = vmatmul.msk.f32.gmra.mxu0 %vm357_vm1, %v342_v61 }
  0xcb   : > { %628 = vmax.xlane.f32.xlu0 %v627_v63  ;;  %v2606_v26 = vpop.f32.mrf.mxu3 }
  0xcc   : > { %3722 = vst [vmem:[#allocation19_spill] sm:$0xff] %v2606_v26 }
  0xcf   : > { %v2419_v0 = vpop.f32.mrf.mxu0 }
  0xd0   : > { %3712 = vst [vmem:[#allocation9_spill] sm:$0xff] %v2419_v0  ;;  %v579_v2 = vand.u32 2147483647, %v2419_v0 }
  0xd2   : > { %v630_v3 = vsel %vm605_vm2, %v579_v2, -inf  ;;  %2096 = vmatmul.msk.f32.gmra.mxu0 %vm357_vm1, %v343_v1  ;;  %v3664_v1 = vand.u32 2147483647, %v2499_v59 }
  0xd3   : > { %631 = vmax.xlane.f32.xlu2 %v630_v3 }
  0xd7   : > { %v2427_v4 = vpop.f32.mrf.mxu0 }
  0xd8   : > { %3713 = vst [vmem:[#allocation10_spill] sm:$0xff] %v2427_v4  ;;  %v580_v5 = vand.u32 2147483647, %v2427_v4 }
  0xda   : > { %v633_v6 = vsel %vm605_vm2, %v580_v5, -inf }
  0xdb   : > { %634 = vmax.xlane.f32.xlu1 %v633_v6 }
  0xdf   : > { %v2433_v7 = vpop.f32.mrf.mxu0 }
  0xe0   : > { %3714 = vst [vmem:[#allocation11_spill] sm:$0xff] %v2433_v7  ;;  %v581_v8 = vand.u32 2147483647, %v2433_v7 }
  0xe2   : > { %v636_v9 = vsel %vm605_vm2, %v581_v8, -inf }
  0xe3   : > { %637 = vmax.xlane.f32.xlu0 %v636_v9 }
  0xe7   : > { %v2439_v10 = vpop.f32.mrf.mxu0 }
  0xe8   : > { %3715 = vst [vmem:[#allocation12_spill] sm:$0xff] %v2439_v10  ;;  %v3673_v11 = vand.u32 2147483647, %v2439_v10 }
  0xea   : > { %v639_v12 = vsel %vm605_vm2, %v3673_v11, -inf }
  0xeb   : > { %640 = vmax.xlane.f32.xlu2 %v639_v12  ;;  %v690_v12 = vsel %vm605_vm2, %v3664_v1, -inf }
  0xef   : > { %v2445_v13 = vpop.f32.mrf.mxu0 }
  0xf0   : > { %3716 = vst [vmem:[#allocation13_spill] sm:$0xff] %v2445_v13  ;;  %v3672_v14 = vand.u32 2147483647, %v2445_v13 }
  0xf2   : > { %v642_v15 = vsel %vm605_vm2, %v3672_v14, -inf }
  0xf3   : > { %643 = vmax.xlane.f32.xlu0 %v642_v15 }
  0xf7   : > { %v2453_v17 = vpop.f32.mrf.mxu0 }
  0xf8   : > { %3717 = vst [vmem:[#allocation14_spill] sm:$0xff] %v2453_v17  ;;  %v3671_v18 = vand.u32 2147483647, %v2453_v17 }
  0xfa   : > { %v645_v19 = vsel %vm605_vm2, %v3671_v18, -inf }
  0xfb   : > { %646 = vmax.xlane.f32.xlu1 %v645_v19 }
  0xff   : > { %v2459_v20 = vpop.f32.mrf.mxu0 }
 0x100   : > { %v3668_v22 = vand.u32 2147483647, %v2459_v20 }
 0x102   : > { %v648_v28 = vsel %vm605_vm2, %v3668_v22, -inf }
 0x103   : > { %649 = vmax.xlane.f32.xlu2 %v648_v28 }
 0x106   : > { %v608_v31 = vpop.xlane.xlu0 %607 }
 0x107   : > { %vm702_vm3 = vcmp.eq.f32.partialorder %v571_v23, %v608_v31  ;;  %v2470_v35 = vpop.f32.mrf.mxu0 }
 0x108   : > { %v734_v36 = vsel %vm702_vm3, %v2466_v30, 32  ;;  %v3665_v48 = vand.u32 2147483647, %v2470_v35 }
 0x109   : > { %v2474_v38 = vsel %vm605_vm2, %v734_v36, 2147483647 }
 0x10a   : > { %v768_v42 = vshra.s32 %v2474_v38, 16 }
 0x10c   : > { %v2477_v43 = vcvt.s32.f32 %v768_v42  ;;  %v2517_v16 = vpop.xlane.xlu2 %682 }
 0x10e   : > { %v611_v46 = vpop.xlane.xlu0 %610  ;;  %771 = vmin.xlane.f32.xlu0 %v2477_v43 }
 0x10f   : > { %vm703_vm4 = vcmp.eq.f32.partialorder %v572_v29, %v611_v46  ;;  %v2483_v23 = vpop.f32.mrf.mxu0  ;;  %v651_v29 = vsel %vm605_vm2, %v3665_v48, -inf }
 0x110   : > { %3718 = vst [vmem:[#allocation15_spill] sm:$0xff] %v2483_v23  ;;  %v735_v49 = vsel %vm703_vm4, %v2466_v30, 32  ;;  %v3666_v50 = vand.u32 2147483647, %v2483_v23 }
 0x111   : > { %v2488_v52 = vsel %vm605_vm2, %v735_v49, 2147483647 }
 0x112   : > { %v654_v54 = vsel %vm605_vm2, %v3666_v50, -inf  ;;  %v783_v55 = vshra.s32 %v2488_v52, 16 }
 0x113   : > { %655 = vmax.xlane.f32.xlu1 %v654_v54 }
 0x114   : > { %v2497_v57 = vcvt.s32.f32 %v783_v55 }
 0x116   : > { %v614_v61 = vpop.xlane.xlu1 %613  ;;  %786 = vmin.xlane.f32.xlu2 %v2497_v57  ;;  %652 = vmax.xlane.f32.xlu0 %v651_v29 }
 0x117   : > { %vm704_vm5 = vcmp.eq.f32.partialorder %v573_v37, %v614_v61  ;;  %v2504_v63 = vpop.f32.mrf.mxu0 }
 0x118   : > { %3720 = vst [vmem:[#allocation17_spill] sm:$0xff] %v2504_v63  ;;  %v736_v3 = vsel %vm704_vm5, %v2466_v30, 32 }
 0x119   : > { %v2509_v6 = vsel %vm605_vm2, %v736_v3, 2147483647 }
 0x11a   : > { %v798_v9 = vshra.s32 %v2509_v6, 16 }
 0x11c   : > { %v2515_v15 = vcvt.s32.f32 %v798_v9 }
 0x11e   : > { %v2519_v37 = vpop.xlane.xlu1 %688  ;;  %691 = vmax.xlane.f32.xlu2 %v690_v12  ;;  %801 = vmin.xlane.f32.xlu1 %v2515_v15 }
 0x11f   : > { %v2522_v19 = vpop.f32.mrf.mxu0 }
 0x120   : > { %3721 = vst [vmem:[#allocation18_spill] sm:$0xff] %v2522_v19 }
 0x126   : > { %v617_v28 = vpop.xlane.xlu1 %616  ;;  %v620_v31 = vpop.xlane.xlu2 %619 }
 0x127   : > { %vm705_vm6 = vcmp.eq.f32.partialorder %v574_v44, %v617_v28  ;;  %vm706_vm7 = vcmp.eq.f32.partialorder %v575_v47, %v620_v31  ;;  %v2528_v36 = vpop.f32.mrf.mxu0 }
 0x128   : > { %v737_v42 = vsel %vm705_vm6, %v2466_v30, 32  ;;  %v738_v46 = vsel %vm706_vm7, %v2466_v30, 32 }
 0x129   : > { %v2533_v49 = vsel %vm605_vm2, %v737_v42, 2147483647  ;;  %v2536_v54 = vsel %vm605_vm2, %v738_v46, 2147483647  ;;  %v2557_v42 = vpop.xlane.xlu0 %685 }
 0x12a   : > { %v828_v55 = vshra.s32 %v2536_v54, 16  ;;  %v813_v29 = vshra.s32 %v2533_v49, 16 }
 0x12c   : > { %v2540_v44 = vcvt.s32.f32 %v828_v55  ;;  %v2542_v61 = vcvt.s32.f32 %v813_v29 }
 0x12e   : > { %v623_v47 = vpop.xlane.xlu2 %622  ;;  %831 = vmin.xlane.f32.xlu2 %v2540_v44  ;;  %816 = vmin.xlane.f32.xlu0 %v2542_v61 }
 0x12f   : > { %vm707_vm8 = vcmp.eq.f32.partialorder %v576_v53, %v623_v47  ;;  %v2548_v3 = vpop.f32.mrf.mxu0 }
 0x130   : > { %v739_v9 = vsel %vm707_vm8, %v2466_v30, 32 }
 0x131   : > { %v2552_v12 = vsel %vm605_vm2, %v739_v9, 2147483647 }
 0x132   : > { %v843_v28 = vshra.s32 %v2552_v12, 16 }
 0x134   : > { %v2555_v31 = vcvt.s32.f32 %v843_v28 }
 0x136   : > { %v626_v46 = vpop.xlane.xlu1 %625  ;;  %846 = vmin.xlane.f32.xlu1 %v2555_v31 }
 0x137   : > { %vm708_vm9 = vcmp.eq.f32.partialorder %v577_v58, %v626_v46  ;;  %v2562_v53 = vpop.f32.mrf.mxu0 }
 0x138   : > { %v740_v55 = vsel %vm708_vm9, %v2466_v30, 32 }
 0x139   : > { %v2566_v29 = vsel %vm605_vm2, %v740_v55, 2147483647 }
 0x13a   : > { %v858_v47 = vshra.s32 %v2566_v29, 16 }
 0x13c   : > { %v2569_v9 = vcvt.s32.f32 %v858_v47 }
 0x13e   : > { %v629_v28 = vpop.xlane.xlu0 %628  ;;  %861 = vmin.xlane.f32.xlu2 %v2569_v9 }
 0x13f   : > { %vm709_vm10 = vcmp.eq.f32.partialorder %v578_v62, %v629_v28  ;;  %v2574_v24 = vpop.f32.mrf.mxu0 }
 0x140   : > { %v741_v58 = vsel %vm709_vm10, %v2466_v30, 32 }
 0x141   : > { %v2578_v46 = vsel %vm605_vm2, %v741_v58, 2147483647 }
 0x142   : > { %v873_v55 = vshra.s32 %v2578_v46, 16 }
 0x144   : > { %v2581_v1 = vcvt.s32.f32 %v873_v55 }
 0x146   : > { %v632_v48 = vpop.xlane.xlu2 %631  ;;  %876 = vmin.xlane.f32.xlu0 %v2581_v1 }
 0x147   : > { %vm710_vm11 = vcmp.eq.f32.partialorder %v579_v2, %v632_v48  ;;  %v2586_v47 = vpop.f32.mrf.mxu0 }
 0x148   : > { %v742_v62 = vsel %vm710_vm11, %v2466_v30, 32 }
 0x149   : > { %v2590_v28 = vsel %vm605_vm2, %v742_v62, 2147483647 }
 0x14a   : > { %v888_v58 = vshra.s32 %v2590_v28, 16 }
 0x14c   : > { %v2593_v50 = vcvt.s32.f32 %v888_v58 }
 0x14e   : > { %v635_v40 = vpop.xlane.xlu1 %634  ;;  %891 = vmin.xlane.f32.xlu1 %v2593_v50 }
 0x14f   : > { %vm711_vm12 = vcmp.eq.f32.partialorder %v580_v5, %v635_v40  ;;  %v2598_v55 = vpop.f32.mrf.mxu0 }
 0x150   : > { %v743_v2 = vsel %vm711_vm12, %v2466_v30, 32  ;;  %v3674_v48 = vand.u32 2147483647, %v2598_v55 }
 0x151   : > { %v2603_v22 = vsel %vm605_vm2, %v743_v2, 2147483647  ;;  %v3676_v2 = vand.u32 2147483647, %v2504_v63 }
 0x152   : > { %v903_v62 = vshra.s32 %v2603_v22, 16  ;;  %v678_v58 = vsel %vm605_vm2, %v3674_v48, -inf }
 0x154   : > { %v2611_v33 = vcvt.s32.f32 %v903_v62  ;;  %v2624_v62 = vpop.f32.mrf.mxu3 }
 0x155   : > { %3723 = vst [vmem:[#allocation20_spill] sm:$0xff] %v2624_v62 }
 0x156   : > { %v638_v40 = vpop.xlane.xlu0 %637  ;;  %906 = vmin.xlane.f32.xlu2 %v2611_v33  ;;  %679 = vmax.xlane.f32.xlu1 %v678_v58  ;;  %v657_v58 = vsel %vm605_vm2, %v3676_v2, -inf }
 0x157   : > { %vm712_vm13 = vcmp.eq.f32.partialorder %v581_v8, %v638_v40  ;;  %v3724_v8 = vand.u32 2147483647, %v2439_v10  ;;  %v3681_v40 = vand.u32 2147483647, %v2624_v62 }
 0x158   : > { %v744_v5 = vsel %vm712_vm13, %v2466_v30, 32 }
 0x159   : > { %v2619_v18 = vsel %vm605_vm2, %v744_v5, 2147483647  ;;  %v696_v2 = vsel %vm605_vm2, %v3681_v40, -inf  ;;  %v782_v40 = vand.u32 65535, %v2488_v52  ;;  %v3726_v52 = vand.u32 2147483647, %v2453_v17 }
 0x15a   : > { %v918_v14 = vshra.s32 %v2619_v18, 16 }
 0x15c   : > { %v2622_v11 = vcvt.s32.f32 %v918_v14 }
 0x15e   : > { %v641_v48 = vpop.xlane.xlu2 %640  ;;  %921 = vmin.xlane.f32.xlu0 %v2622_v11  ;;  %658 = vmax.xlane.f32.xlu2 %v657_v58 }
 0x15f   : > { %vm713_vm14 = vcmp.eq.f32.partialorder %v3724_v8, %v641_v48  ;;  %v767_v48 = vand.u32 65535, %v2474_v38 }
 0x160   : > { %v745_v5 = vsel %vm713_vm14, %v2466_v30, 32 }
 0x161   : > { %v2635_v14 = vsel %vm605_vm2, %v745_v5, 2147483647  ;;  %v769_v5 = vcvt.s32.f32 %v767_v48 }
 0x162   : > { %v933_v7 = vshra.s32 %v2635_v14, 16 }
 0x164   : > { %v2641_v4 = vcvt.s32.f32 %v933_v7  ;;  %v3685_v7 = vand.u32 2147483647, %v2606_v26 }
 0x166   : > { %697 = vmax.xlane.f32.xlu2 %v696_v2  ;;  %936 = vmin.xlane.f32.xlu1 %v2641_v4  ;;  %v644_v58 = vpop.xlane.xlu0 %643  ;;  %v3725_v2 = vand.u32 2147483647, %v2445_v13  ;;  %v693_v48 = vsel %vm605_vm2, %v3685_v7, -inf  ;;  %v3687_v13 = vand.u32 2147483647, %v2522_v19 }
 0x168   : > { %vm714_vm0 = vcmp.eq.f32.partialorder %v3725_v2, %v644_v58 }
 0x169   : > { %v746_v38 = vsel %vm714_vm0, %v2466_v30, 32 }
 0x16e   : > { %v647_v8 = vpop.xlane.xlu1 %646 }
 0x16f   : > { %vm715_vm4 = vcmp.eq.f32.partialorder %v3726_v52, %v647_v8 }
 0x176   : > { %v2645_v10 = vpop.xlane.xlu2 %649 }
 0x181   : > { %v2647_v0 = vpop.xlane.xlu0 %771 }
 0x182   : > { %vm773_vm15 = vcmp.eq.f32.partialorder %v2477_v43, %v2647_v0  ;;  %v784_v43 = vcvt.s32.f32 %v782_v40  ;;  %v747_v40 = vsel %vm715_vm4, %v2466_v30, 32 }
 0x183   : > { %v774_v60 = vsel %vm773_vm15, %v769_v5, inf  ;;  %v797_v5 = vand.u32 65535, %v2509_v6  ;;  %v660_v6 = vsel %vm605_vm2, %v3687_v13, -inf }
 0x184   : > { %775 = vmin.xlane.f32.xlu0 %v774_v60  ;;  %v2666_v60 = vsel %vm605_vm2, %v746_v38, 2147483647  ;;  %v2681_v38 = vsel %vm605_vm2, %v747_v40, 2147483647 }
 0x185   : > { %v948_v2 = vshra.s32 %v2666_v60, 16 }
 0x186   : > { %v2656_v56 = vpop.xlane.xlu1 %655 }
 0x187   : > { %v2676_v45 = vcvt.s32.f32 %v948_v2 }
 0x189   : > { %v2658_v51 = vpop.xlane.xlu2 %786 }
 0x18a   : > { %vm788_vm3 = vcmp.eq.f32.partialorder %v2497_v57, %v2658_v51  ;;  %v799_v57 = vcvt.s32.f32 %v797_v5  ;;  %v2695_v5 = vpop.xlane.xlu0 %652 }
 0x18b   : > { %v789_v58 = vsel %vm788_vm3, %v784_v43, inf  ;;  %v3728_v43 = vand.u32 2147483647, %v2355_v32 }
 0x18c   : > { %694 = vmax.xlane.f32.xlu0 %v693_v48  ;;  %790 = vmin.xlane.f32.xlu1 %v789_v58  ;;  %v2683_v48 = vpop.f32.mrf.mxu3  ;;  %v963_v58 = vshra.s32 %v2681_v38, 16 }
 0x18d   : > { %3727 = vst [vmem:[#allocation21_spill] sm:$0xff] %v2683_v48  ;;  %vm728_vm6 = vcmp.eq.f32.partialorder %v3728_v43, %v2557_v42  ;;  %v3729_v42 = vand.u32 2147483647, %v2341_v25  ;;  %v827_v43 = vand.u32 65535, %v2536_v54 }
 0x18e   : > { %v760_v52 = vsel %vm728_vm6, %v2466_v30, 32  ;;  %v2699_v40 = vcvt.s32.f32 %v963_v58 }
 0x18f   : > { %vm727_vm7 = vcmp.eq.f32.partialorder %v3729_v42, %v2517_v16  ;;  %v829_v17 = vcvt.s32.f32 %v827_v43 }
 0x190   : > { %v759_v13 = vsel %vm727_vm7, %v2466_v30, 32 }
 0x191   : > { %v2674_v7 = vpop.xlane.xlu1 %801  ;;  %v2697_v2 = vpop.xlane.xlu2 %691  ;;  %v2726_v16 = vsel %vm605_vm2, %v759_v13, 2147483647 }
 0x192   : > { %vm803_vm5 = vcmp.eq.f32.partialorder %v2515_v15, %v2674_v7  ;;  %v3689_v15 = vand.u32 2147483647, %v2683_v48  ;;  %v1143_v42 = vshra.s32 %v2726_v16, 16 }
 0x193   : > { %v804_v8 = vsel %vm803_vm5, %v799_v57, inf }
 0x194   : > { %951 = vmin.xlane.f32.xlu0 %v2676_v45  ;;  %805 = vmin.xlane.f32.xlu2 %v804_v8  ;;  %v699_v57 = vsel %vm605_vm2, %v3689_v15, -inf  ;;  %v2705_v8 = vsel %vm605_vm2, %v760_v52, 2147483647  ;;  %v2733_v43 = vcvt.s32.f32 %v1143_v42 }
 0x195   : > { %661 = vmax.xlane.f32.xlu1 %v660_v6  ;;  %v812_v6 = vand.u32 65535, %v2533_v49  ;;  %v1158_v58 = vshra.s32 %v2705_v8, 16 }
 0x197   : > { %v814_v52 = vcvt.s32.f32 %v812_v6  ;;  %v2721_v25 = vcvt.s32.f32 %v1158_v58 }
 0x19c   : > { %966 = vmin.xlane.f32.xlu2 %v2699_v40 }
 0x19d   : > { %700 = vmax.xlane.f32.xlu1 %v699_v57  ;;  %v842_v57 = vand.u32 65535, %v2552_v12  ;;  %v3730_v12 = vand.u32 2147483647, %v2459_v20 }
 0x19f   : > { %vm716_vm11 = vcmp.eq.f32.partialorder %v3730_v12, %v2645_v10 }
 0x1a1   : > { %v2715_v32 = vpop.xlane.xlu2 %831  ;;  %v2717_v15 = vpop.xlane.xlu0 %816 }
 0x1a2   : > { %vm818_vm8 = vcmp.eq.f32.partialorder %v2542_v61, %v2717_v15  ;;  %vm833_vm9 = vcmp.eq.f32.partialorder %v2540_v44, %v2715_v32  ;;  %v844_v61 = vcvt.s32.f32 %v842_v57 }
 0x1a3   : > { %v819_v49 = vsel %vm818_vm8, %v814_v52, inf  ;;  %v834_v54 = vsel %vm833_vm9, %v829_v17, inf  ;;  %v3692_v17 = vand.u32 2147483647, %v2528_v36  ;;  %v872_v52 = vand.u32 65535, %v2578_v46 }
 0x1a4   : > { %820 = vmin.xlane.f32.xlu0 %v819_v49  ;;  %1161 = vmin.xlane.f32.xlu2 %v2721_v25  ;;  %v748_v49 = vsel %vm716_vm11, %v2466_v30, 32  ;;  %vm1586_vm11 = vcmask 7168  }
 0x1a5   : > { %835 = vmin.xlane.f32.xlu1 %v834_v54  ;;  %v663_v44 = vsel %vm605_vm2, %v3692_v17, -inf  ;;  %v874_v57 = vcvt.s32.f32 %v872_v52  ;;  %v2757_v10 = vsel %vm605_vm2, %v748_v49, 2147483647 }
 0x1a6   : > { %v978_v46 = vshra.s32 %v2757_v10, 16 }
 0x1a8   : > { %v2767_v52 = vcvt.s32.f32 %v978_v46 }
 0x1a9   : > { %v2731_v6 = vpop.xlane.xlu1 %846 }
 0x1aa   : > { %vm848_vm10 = vcmp.eq.f32.partialorder %v2555_v31, %v2731_v6  ;;  %v857_v31 = vand.u32 65535, %v2566_v29  ;;  %v3731_v29 = vand.u32 2147483647, %v2369_v39  ;;  %v853_v39 = vcvt.f32.s32 %v2731_v6 }
 0x1ab   : > { %v849_v13 = vsel %vm848_vm10, %v844_v61, inf }
 0x1ac   : > { %1146 = vmin.xlane.f32.xlu0 %v2733_v43  ;;  %850 = vmin.xlane.f32.xlu2 %v849_v13  ;;  %v859_v42 = vcvt.s32.f32 %v857_v31  ;;  %vm729_vm14 = vcmp.eq.f32.partialorder %v3731_v29, %v2519_v37  ;;  %v902_v37 = vand.u32 65535, %v2603_v22  ;;  %v3733_v22 = vand.u32 2147483647, %v2483_v23 }
 0x1ad   : > { %v808_v23 = vcvt.f32.s32 %v2674_v7 }
 0x1ae   : > { %vm718_vm4 = vcmp.eq.f32.partialorder %v3733_v22, %v2656_v56 }
 0x1b1   : > { %v2745_v58 = vpop.xlane.xlu2 %861 }
 0x1b2   : > { %vm863_vm12 = vcmp.eq.f32.partialorder %v2569_v9, %v2745_v58  ;;  %v887_v9 = vand.u32 65535, %v2590_v28 }
 0x1b3   : > { %v864_v13 = vsel %vm863_vm12, %v859_v42, inf }
 0x1b4   : > { %664 = vmax.xlane.f32.xlu0 %v663_v44  ;;  %v761_v44 = vsel %vm729_vm14, %v2466_v30, 32 }
 0x1b5   : > { %v2772_v31 = vsel %vm605_vm2, %v761_v44, 2147483647 }
 0x1b6   : > { %v1173_v28 = vshra.s32 %v2772_v31, 16 }
 0x1b9   : > { %v2752_v54 = vpop.xlane.xlu0 %876 }
 0x1ba   : > { %vm878_vm13 = vcmp.eq.f32.partialorder %v2581_v1, %v2752_v54  ;;  %v889_v1 = vcvt.s32.f32 %v887_v9 }
 0x1bb   : > { %v879_v61 = vsel %vm878_vm13, %v874_v57, inf }
 0x1bc   : > { %880 = vmin.xlane.f32.xlu2 %v879_v61  ;;  %865 = vmin.xlane.f32.xlu0 %v864_v13  ;;  %v904_v61 = vcvt.s32.f32 %v902_v37  ;;  %v3732_v13 = vand.u32 2147483647, %v2598_v55  ;;  %v750_v37 = vsel %vm718_vm4, %v2466_v30, 32 }
 0x1c1   : > { %v2765_v12 = vpop.xlane.xlu1 %891 }
 0x1c2   : > { %vm893_vm15 = vcmp.eq.f32.partialorder %v2593_v50, %v2765_v12  ;;  %v2783_v50 = vcvt.s32.f32 %v1173_v28  ;;  %v355_v28 = vld [vmem:[%s3657_s2 + $0x18] sm:$0xff] }
 0x1c3   : > { %v894_v49 = vsel %vm893_vm15, %v889_v1, inf  ;;  %v3693_v1 = vand.u32 2147483647, %v2562_v53  ;;  %1453 = vmatpush.msra.mxu1 %v355_v28  ;;  %2171 = vmatpush.msrb.mxu3 %v355_v28 }
 0x1c4   : > { %981 = vmin.xlane.f32.xlu0 %v2767_v52  ;;  %895 = vmin.xlane.f32.xlu1 %v894_v49 }
 0x1c9   : > { %v2777_v57 = vpop.xlane.xlu2 %906  ;;  %v680_v42 = vpop.xlane.xlu1 %679 }
 0x1ca   : > { %vm726_vm0 = vcmp.eq.f32.partialorder %v3732_v13, %v680_v42  ;;  %vm908_vm3 = vcmp.eq.f32.partialorder %v2611_v33, %v2777_v57  ;;  %v3694_v33 = vand.u32 2147483647, %v2574_v24  ;;  %v3734_v42 = vand.u32 2147483647, %v2470_v35 }
 0x1cb   : > { %v758_v29 = vsel %vm726_vm0, %v2466_v30, 32  ;;  %v909_v9 = vsel %vm908_vm3, %v904_v61, inf  ;;  %v2230_v13 = vmov 1.0  }
 0x1cc   : > { %v2787_v46 = vsel %vm605_vm2, %v758_v29, 2147483647  ;;  %910 = vmin.xlane.f32.xlu2 %v909_v9  ;;  %1176 = vmin.xlane.f32.xlu0 %v2783_v50  ;;  %vm2806_vm5 = vcmp.eq.f32.partialorder %v3734_v42, %v2695_v5  ;;  %v2811_v29 = vsel %vm605_vm2, %v750_v37, 2147483647  ;;  %v669_v9 = vsel %vm605_vm2, %v3693_v1, -inf }
 0x1cd   : > { %v1128_v44 = vshra.s32 %v2787_v46, 16  ;;  %1631 = vmatpush.msra.mxu2 %v2230_v13  ;;  %v672_v22 = vsel %vm605_vm2, %v3694_v33, -inf  ;;  %v3695_v5 = vand.u32 2147483647, %v2548_v3  ;;  %v3737_v37 = vand.u32 2147483647, %v2504_v63 }
 0x1ce   : > { %v917_v1 = vand.u32 65535, %v2619_v18  ;;  %v1008_v28 = vshra.s32 %v2811_v29, 16  ;;  %v353_v33 = vld [vmem:[%s3657_s2 + $0x8] sm:$0xff] }
 0x1cf   : > { %v2796_v49 = vcvt.s32.f32 %v1128_v44  ;;  %v749_v44 = vsel %vm2806_vm5, %v2466_v30, 32  ;;  %1632 = vmatpush.msra.mxu2 %v2230_v13 }
 0x1d0   : > { %v919_v18 = vcvt.s32.f32 %v917_v1 }
 0x1d1   : > { %1131 = vmin.xlane.f32.xlu1 %v2796_v49  ;;  %v659_v61 = vpop.xlane.xlu2 %658  ;;  %v2823_v42 = vpop.xlane.xlu0 %921  ;;  %1633 = vmatpush.msra.mxu2 %v2230_v13 }
 0x1d2   : > { %vm2827_vm6 = vcmp.eq.f32.partialorder %v3737_v37, %v659_v61  ;;  %v666_v61 = vsel %vm605_vm2, %v3695_v5, -inf  ;;  %vm923_vm7 = vcmp.eq.f32.partialorder %v2622_v11, %v2823_v42  ;;  %v2854_v37 = vcvt.s32.f32 %v1008_v28 }
 0x1d3   : > { %v751_v56 = vsel %vm2827_vm6, %v2466_v30, 32  ;;  %1634 = vmatpush.msra.mxu2 %v2230_v13  ;;  %v924_v1 = vsel %vm923_vm7, %v919_v18, inf  ;;  %v932_v5 = vand.u32 65535, %v2635_v14  ;;  %v793_v14 = vcvt.f32.s32 %v2658_v51 }
 0x1d4   : > { %670 = vmax.xlane.f32.xlu2 %v669_v9  ;;  %673 = vmax.xlane.f32.xlu0 %v672_v22  ;;  %v2834_v9 = vsel %vm605_vm2, %v749_v44, 2147483647  ;;  %v354_v22 = vld [vmem:[%s3657_s2 + $0x10] sm:$0xff]  ;;  %v3740_v44 = vand.u32 2147483647, %v2499_v59 }
 0x1d5   : > { %1454 = vmatpush.msra.mxu1 %v354_v22  ;;  %2172 = vmatpush.msrb.mxu3 %v354_v22  ;;  %v2857_v11 = vsel %vm605_vm2, %v751_v56, 2147483647 }
 0x1d6   : > { %vm2850_vm8 = vcmp.eq.f32.partialorder %v3740_v44, %v2697_v2  ;;  %v352_v2 = vld [vmem:[%s3657_s2] sm:$0xff]  ;;  %v1023_v56 = vshra.s32 %v2857_v11, 16 }
 0x1d7   : > { %v762_v28 = vsel %vm2850_vm8, %v2466_v30, 32  ;;  %1455 = vmatpush.msra.mxu1 %v353_v33  ;;  %2173 = vmatpush.msrb.mxu3 %v353_v33 }
 0x1d8   : > { %v2874_v44 = vsel %vm605_vm2, %v762_v28, 2147483647  ;;  %v2879_v17 = vcvt.s32.f32 %v1023_v56 }
 0x1d9   : > { %667 = vmax.xlane.f32.xlu1 %v666_v61  ;;  %v993_v61 = vshra.s32 %v2834_v9, 16  ;;  %v698_v18 = vpop.xlane.xlu2 %697  ;;  %1456 = vmatpush.msra.mxu1 %v352_v2  ;;  %v1188_v33 = vshra.s32 %v2874_v44, 16 }
 0x1da   : > { %2174 = vmatpush.msrb.mxu3 %v352_v2 }
 0x1db   : > { %v2871_v22 = vcvt.s32.f32 %v993_v61  ;;  %v2884_v2 = vcvt.s32.f32 %v1188_v33  ;;  %v934_v33 = vcvt.s32.f32 %v932_v5 }
 0x1dc   : > { %1011 = vmin.xlane.f32.xlu2 %v2854_v37  ;;  %925 = vmin.xlane.f32.xlu0 %v924_v1  ;;  %v3743_v1 = vand.u32 2147483647, %v2624_v62 }
 0x1dd   : > { %2175 = vmatpush.msra.mxu3 %v2230_v13 }
 0x1de   : > { %vm732_vm9 = vcmp.eq.f32.partialorder %v3743_v1, %v698_v18  ;;  %v2894_v1 = vpop.xlane.xlu1 %936 }
 0x1df   : > { %2176 = vmatpush.msra.mxu3 %v2230_v13  ;;  %v764_v61 = vsel %vm732_vm9, %v2466_v30, 32  ;;  %vm938_vm10 = vcmp.eq.f32.partialorder %v2641_v4, %v2894_v1 }
 0x1e0   : > { %v2887_v28 = vsel %vm605_vm2, %v764_v61, 2147483647  ;;  %v2903_v61 = vld [vmem:[%s3658_s3] ss:$0 sm:$0xff]  ;;  %v939_v63 = vsel %vm938_vm10, %v934_v33, inf  ;;  %v794_v33 = vshll.u32 %v793_v14, 16 }
 0x1e1   : > { %996 = vmin.xlane.f32.xlu1 %v2871_v22  ;;  %2177 = vmatpush.msra.mxu3 %v2230_v13  ;;  %v1218_v56 = vshra.s32 %v2887_v28, 16  ;;  %v1281_v4 = vmul.f32 %v2903_v61, %v2333_v21 }
 0x1e3   : > { %2178 = vmatpush.msra.mxu3 %v2230_v13  ;;  %v2891_v18 = vcvt.s32.f32 %v1218_v56  ;;  %v778_v13 = vcvt.f32.s32 %v2647_v0 }
 0x1e4   : > { %1026 = vmin.xlane.f32.xlu0 %v2879_v17 }
 0x1e5   : > { %v779_v56 = vshll.u32 %v778_v13, 16 }
 0x1e9   : > { %1191 = vmin.xlane.f32.xlu1 %v2884_v2 }
 0x1f1   : > { %1221 = vmin.xlane.f32.xlu1 %v2891_v18 }
 0x1f7   : > { %v776_v62 = vpop.xlane.xlu0 %775 }
 0x1f8   : > { %v777_v59 = vcvt.f32.s32 %v776_v62 }
 0x1f9   : > { %940 = vmin.xlane.f32.xlu1 %v939_v63 }
 0x1fa   : > { %v780_v0 = vadd.s32 %v779_v56, %v777_v59  ;;  %v3744_v59 = vand.u32 2147483647, %v2606_v26 }
 0x1fc   : > { %1587 = vst.msk [vmem:[%s2909_s22] sm:$0xff] %vm1586_vm11, %v780_v0  ;;  %vm1246_vm12 = vcmp.eq.s32.totalorder %v2466_v30, %v780_v0  ;;  %v1282_v0 = vmul.f32 %v2903_v61, %v2344_v27 }
 0x1fd   : > { %v1313_v62 = vsel %vm1246_vm12, %v1281_v4, 0.0 }
 0x1fe   : > { %2104 = vmatmul.msk.f32.vlgmr.msra.gmra.mxu1 %vm605_vm2, %v1313_v62  ;;  %2136 = vmatmul.msk.f32.vlgmr.msra.gmra.mxu2 %vm605_vm2, %v1313_v62  ;;  %v947_v62 = vand.u32 65535, %v2666_v60 }
 0x1ff   : > { %v695_v5 = vpop.xlane.xlu0 %694  ;;  %v791_v13 = vpop.xlane.xlu1 %790 }
 0x200   : > { %vm731_vm13 = vcmp.eq.f32.partialorder %v3744_v59, %v695_v5  ;;  %v792_v63 = vcvt.f32.s32 %v791_v13  ;;  %v949_v60 = vcvt.s32.f32 %v947_v62 }
 0x201   : > { %v763_v21 = vsel %vm731_vm13, %v2466_v30, 32 }
 0x202   : > { %v2923_v51 = vsel %vm605_vm2, %v763_v21, 2147483647  ;;  %v795_v56 = vadd.s32 %v794_v33, %v792_v63  ;;  %v809_v33 = vshll.u32 %v808_v23, 16  ;;  %v3745_v63 = vand.u32 2147483647, %v2522_v19  ;;  %v3747_v19 = vld [vmem:[#allocation5_spill] sm:$0xff] }
 0x203   : > { %v1203_v4 = vshra.s32 %v2923_v51, 16  ;;  %v1285_v26 = vmul.f32 %v2903_v61, %v3747_v19 }
 0x204   : > { %1588 = vst.msk [vmem:[%s2909_s22 + $0x8] sm:$0xff] %vm1586_vm11, %v795_v56  ;;  %vm1247_vm14 = vcmp.eq.s32.totalorder %v2466_v30, %v795_v56  ;;  %v3700_v56 = vand.u32 2147483647, %v2586_v47 }
 0x205   : > { %v1314_v14 = vsel %vm1247_vm14, %v1282_v0, 0.0  ;;  %v2933_v5 = vcvt.s32.f32 %v1203_v4  ;;  %v1283_v4 = vmul.f32 %v2903_v61, %v2358_v34 }
 0x206   : > { %2105 = vmatmul.msk.f32.gmra.mxu1 %vm605_vm2, %v1314_v14  ;;  %2137 = vmatmul.msk.f32.gmra.mxu2 %vm605_vm2, %v1314_v14  ;;  %v675_v62 = vsel %vm605_vm2, %v3700_v56, -inf }
 0x207   : > { %v2937_v13 = vpop.xlane.xlu0 %951  ;;  %v806_v27 = vpop.xlane.xlu2 %805  ;;  %1206 = vmin.xlane.f32.xlu2 %v2933_v5 }
 0x208   : > { %v807_v7 = vcvt.f32.s32 %v806_v27  ;;  %v662_v59 = vpop.xlane.xlu1 %661  ;;  %vm953_vm15 = vcmp.eq.f32.partialorder %v2676_v45, %v2937_v13 }
 0x209   : > { %vm720_vm0 = vcmp.eq.f32.partialorder %v3745_v63, %v662_v59  ;;  %v954_v21 = vsel %vm953_vm15, %v949_v60, inf  ;;  %v3746_v60 = vand.u32 2147483647, %v2683_v48  ;;  %v823_v59 = vcvt.f32.s32 %v2717_v15 }
 0x20a   : > { %v810_v0 = vadd.s32 %v809_v33, %v807_v7  ;;  %955 = vmin.xlane.f32.xlu0 %v954_v21  ;;  %v752_v14 = vsel %vm720_vm0, %v2466_v30, 32  ;;  %v838_v63 = vcvt.f32.s32 %v2715_v32  ;;  %v1142_v48 = vand.u32 65535, %v2726_v16 }
 0x20b   : > { %v2952_v45 = vsel %vm605_vm2, %v752_v14, 2147483647 }
 0x20c   : > { %1589 = vst.msk [vmem:[%s2909_s22 + $0x10] sm:$0xff] %vm1586_vm11, %v810_v0  ;;  %vm1248_vm3 = vcmp.eq.s32.totalorder %v2466_v30, %v810_v0  ;;  %v1038_v33 = vshra.s32 %v2952_v45, 16  ;;  %v1144_v6 = vcvt.s32.f32 %v1142_v48  ;;  %v3749_v48 = vand.u32 2147483647, %v2528_v36 }
 0x20d   : > { %v1315_v23 = vsel %vm1248_vm3, %v1283_v4, 0.0 }
 0x20e   : > { %2106 = vmatmul.msk.f32.gmra.mxu1 %vm605_vm2, %v1315_v23  ;;  %2138 = vmatmul.msk.f32.gmra.mxu2 %vm605_vm2, %v1315_v23  ;;  %v2967_v21 = vcvt.s32.f32 %v1038_v33  ;;  %v824_v23 = vshll.u32 %v823_v59, 16  ;;  %v1284_v33 = vmul.f32 %v2903_v61, %v2372_v41 }
 0x20f   : > { %v2959_v27 = vpop.xlane.xlu2 %966  ;;  %676 = vmax.xlane.f32.xlu2 %v675_v62 }
 0x210   : > { %v701_v34 = vpop.xlane.xlu1 %700  ;;  %vm968_vm3 = vcmp.eq.f32.partialorder %v2699_v40, %v2959_v27 }
 0x211   : > { %vm733_vm4 = vcmp.eq.f32.partialorder %v3746_v60, %v701_v34  ;;  %v839_v60 = vshll.u32 %v838_v63, 16 }
 0x212   : > { %v765_v7 = vsel %vm733_vm4, %v2466_v30, 32 }
 0x213   : > { %v2970_v0 = vsel %vm605_vm2, %v765_v7, 2147483647 }
 0x214   : > { %v1233_v15 = vshra.s32 %v2970_v0, 16 }
 0x216   : > { %v2987_v63 = vcvt.s32.f32 %v1233_v15 }
 0x217   : > { %v821_v4 = vpop.xlane.xlu0 %820  ;;  %v2972_v14 = vpop.xlane.xlu2 %1161  ;;  %1041 = vmin.xlane.f32.xlu2 %v2967_v21 }
 0x218   : > { %v822_v62 = vcvt.f32.s32 %v821_v4  ;;  %v836_v34 = vpop.xlane.xlu1 %835 }
 0x219   : > { %v837_v56 = vcvt.f32.s32 %v836_v34  ;;  %v3748_v34 = vld [vmem:[#allocation6_spill] sm:$0xff] }
 0x21a   : > { %v825_v32 = vadd.s32 %v824_v23, %v822_v62 }
 0x21b   : > { %v840_v7 = vadd.s32 %v839_v60, %v837_v56  ;;  %v854_v56 = vshll.u32 %v853_v39, 16  ;;  %v1286_v60 = vmul.f32 %v2903_v61, %v3748_v34  ;;  %v3750_v34 = vld [vmem:[#allocation7_spill] sm:$0xff] }
 0x21c   : > { %1590 = vst.msk [vmem:[%s2909_s22 + $0x18] sm:$0xff] %vm1586_vm11, %v825_v32  ;;  %vm1249_vm5 = vcmp.eq.s32.totalorder %v2466_v30, %v825_v32 }
 0x21d   : > { %1591 = vst.msk [vmem:[%s2909_s22 + $0x20] sm:$0xff] %vm1586_vm11, %v840_v7  ;;  %v1316_v59 = vsel %vm1249_vm5, %v1284_v33, 0.0  ;;  %vm1250_vm6 = vcmp.eq.s32.totalorder %v2466_v30, %v840_v7  ;;  %v868_v33 = vcvt.f32.s32 %v2745_v58  ;;  %v883_v7 = vcvt.f32.s32 %v2752_v54 }
 0x21e   : > { %2107 = vmatmul.msk.f32.gmra.mxu1 %vm605_vm2, %v1316_v59  ;;  %2139 = vmatmul.msk.f32.gmra.mxu2 %vm605_vm2, %v1316_v59  ;;  %v1317_v41 = vsel %vm1250_vm6, %v1285_v26, 0.0  ;;  %v1287_v54 = vmul.f32 %v2903_v61, %v3750_v34  ;;  %vm1163_vm6 = vcmp.eq.f32.partialorder %v2721_v25, %v2972_v14 }
 0x21f   : > { %v2992_v19 = vpop.xlane.xlu0 %1146  ;;  %v851_v16 = vpop.xlane.xlu2 %850  ;;  %1236 = vmin.xlane.f32.xlu2 %v2987_v63 }
 0x220   : > { %v852_v4 = vcvt.f32.s32 %v851_v16  ;;  %vm1148_vm7 = vcmp.eq.f32.partialorder %v2733_v43, %v2992_v19 }
 0x221   : > { %v1149_v23 = vsel %vm1148_vm7, %v1144_v6, inf  ;;  %v869_v6 = vshll.u32 %v868_v33, 16 }
 0x222   : > { %v855_v62 = vadd.s32 %v854_v56, %v852_v4  ;;  %1150 = vmin.xlane.f32.xlu0 %v1149_v23  ;;  %v884_v56 = vshll.u32 %v883_v7, 16 }
 0x224   : > { %1592 = vst.msk [vmem:[%s2909_s22 + $0x28] sm:$0xff] %vm1586_vm11, %v855_v62  ;;  %vm1251_vm8 = vcmp.eq.s32.totalorder %v2466_v30, %v855_v62 }
 0x225   : > { %v1318_v26 = vsel %vm1251_vm8, %v1286_v60, 0.0  ;;  %v3751_v60 = vld [vmem:[#allocation8_spill] sm:$0xff] }
 0x226   : > { %2108 = vmatmul.msk.f32.gmra.mxu1 %vm605_vm2, %v1317_v41  ;;  %2140 = vmatmul.msk.f32.gmra.mxu2 %vm605_vm2, %v1317_v41 }
 0x227   : > { %v665_v39 = vpop.xlane.xlu0 %664 }
 0x228   : > { %vm721_vm9 = vcmp.eq.f32.partialorder %v3749_v48, %v665_v39  ;;  %v1288_v39 = vmul.f32 %v2903_v61, %v3751_v60  ;;  %v977_v48 = vand.u32 65535, %v2757_v10  ;;  %v1127_v60 = vand.u32 65535, %v2787_v46 }
 0x229   : > { %v753_v43 = vsel %vm721_vm9, %v2466_v30, 32 }
 0x22a   : > { %v3008_v15 = vsel %vm605_vm2, %v753_v43, 2147483647  ;;  %v979_v7 = vcvt.s32.f32 %v977_v48  ;;  %v3753_v48 = vld [vmem:[#allocation10_spill] sm:$0xff] }
 0x22b   : > { %v1053_v32 = vshra.s32 %v3008_v15, 16 }
 0x22d   : > { %v3013_v59 = vcvt.s32.f32 %v1053_v32 }
 0x22e   : > { %2109 = vmatmul.msk.f32.gmra.mxu1 %vm605_vm2, %v1318_v26  ;;  %2141 = vmatmul.msk.f32.gmra.mxu2 %vm605_vm2, %v1318_v26  ;;  %v898_v26 = vcvt.f32.s32 %v2765_v12 }
 0x22f   : > { %v881_v41 = vpop.xlane.xlu2 %880  ;;  %v866_v16 = vpop.xlane.xlu0 %865  ;;  %1056 = vmin.xlane.f32.xlu0 %v3013_v59 }
 0x230   : > { %v882_v4 = vcvt.f32.s32 %v881_v41  ;;  %v867_v23 = vcvt.f32.s32 %v866_v16  ;;  %v899_v12 = vshll.u32 %v898_v26, 16 }
 0x232   : > { %v885_v62 = vadd.s32 %v884_v56, %v882_v4  ;;  %v870_v58 = vadd.s32 %v869_v6, %v867_v23  ;;  %v3752_v56 = vld [vmem:[#allocation9_spill] sm:$0xff]  ;;  %v913_v23 = vcvt.f32.s32 %v2777_v57  ;;  %v1290_v57 = vmul.f32 %v2903_v61, %v3753_v48 }
 0x233   : > { %v1289_v4 = vmul.f32 %v2903_v61, %v3752_v56 }
 0x234   : > { %1594 = vst.msk [vmem:[%s2909_s22 + $0x38] sm:$0xff] %vm1586_vm11, %v885_v62  ;;  %vm1252_vm10 = vcmp.eq.s32.totalorder %v2466_v30, %v870_v58  ;;  %vm1253_vm12 = vcmp.eq.s32.totalorder %v2466_v30, %v885_v62  ;;  %v914_v34 = vshll.u32 %v913_v23, 16 }
 0x235   : > { %1593 = vst.msk [vmem:[%s2909_s22 + $0x30] sm:$0xff] %vm1586_vm11, %v870_v58  ;;  %v1319_v43 = vsel %vm1252_vm10, %v1287_v54, 0.0  ;;  %v1320_v32 = vsel %vm1253_vm12, %v1288_v39, 0.0 }
 0x236   : > { %2110 = vmatmul.msk.f32.gmra.mxu1 %vm605_vm2, %v1319_v43  ;;  %2142 = vmatmul.msk.f32.gmra.mxu2 %vm605_vm2, %v1319_v43  ;;  %v1129_v43 = vcvt.s32.f32 %v1127_v60 }
 0x237   : > { %v3032_v33 = vpop.xlane.xlu0 %981  ;;  %v896_v10 = vpop.xlane.xlu1 %895 }
 0x238   : > { %v897_v41 = vcvt.f32.s32 %v896_v10  ;;  %vm983_vm13 = vcmp.eq.f32.partialorder %v2767_v52, %v3032_v33 }
 0x239   : > { %v984_v16 = vsel %vm983_vm13, %v979_v7, inf  ;;  %v962_v7 = vand.u32 65535, %v2681_v38 }
 0x23a   : > { %v900_v6 = vadd.s32 %v899_v12, %v897_v41  ;;  %985 = vmin.xlane.f32.xlu2 %v984_v16  ;;  %v928_v41 = vcvt.f32.s32 %v2823_v42 }
 0x23c   : > { %1595 = vst.msk [vmem:[%s2909_s22 + $0x40] sm:$0xff] %vm1586_vm11, %v900_v6  ;;  %vm1254_vm14 = vcmp.eq.s32.totalorder %v2466_v30, %v900_v6  ;;  %v964_v6 = vcvt.s32.f32 %v962_v7 }
 0x23d   : > { %v1321_v62 = vsel %vm1254_vm14, %v1289_v4, 0.0  ;;  %v3757_v4 = vand.u32 2147483647, %v2548_v3 }
 0x23e   : > { %2111 = vmatmul.msk.f32.gmra.mxu1 %vm605_vm2, %v1320_v32  ;;  %2143 = vmatmul.msk.f32.gmra.mxu2 %vm605_vm2, %v1320_v32  ;;  %v969_v38 = vsel %vm968_vm3, %v964_v6, inf }
 0x23f   : > { %v911_v58 = vpop.xlane.xlu2 %910  ;;  %v3044_v52 = vpop.xlane.xlu0 %1176 }
 0x240   : > { %v912_v54 = vcvt.f32.s32 %v911_v58  ;;  %v992_v58 = vand.u32 65535, %v2834_v9  ;;  %vm1178_vm10 = vcmp.eq.f32.partialorder %v2783_v50, %v3044_v52  ;;  %v1187_v50 = vand.u32 65535, %v2874_v44 }
 0x241   : > { %v943_v44 = vcvt.f32.s32 %v2894_v1  ;;  %v958_v1 = vcvt.f32.s32 %v2937_v13 }
 0x242   : > { %v915_v39 = vadd.s32 %v914_v34, %v912_v54  ;;  %v929_v34 = vshll.u32 %v928_v41, 16  ;;  %v994_v7 = vcvt.s32.f32 %v992_v58  ;;  %v3762_v41 = vld [vmem:[#allocation12_spill] sm:$0xff] }
 0x244   : > { %1596 = vst.msk [vmem:[%s2909_s22 + $0x48] sm:$0xff] %vm1586_vm11, %v915_v39  ;;  %v3051_v26 = vpop.xlane.xlu1 %1131  ;;  %vm1255_vm15 = vcmp.eq.s32.totalorder %v2466_v30, %v915_v39 }
 0x245   : > { %vm1133_vm0 = vcmp.eq.f32.partialorder %v2796_v49, %v3051_v26  ;;  %v1322_v32 = vsel %vm1255_vm15, %v1290_v57, 0.0  ;;  %v3754_v49 = vand.u32 2147483647, %v2562_v53 }
 0x246   : > { %2112 = vmatmul.msk.f32.gmra.mxu1 %vm605_vm2, %v1321_v62  ;;  %2144 = vmatmul.msk.f32.gmra.mxu2 %vm605_vm2, %v1321_v62  ;;  %v1134_v46 = vsel %vm1133_vm0, %v1129_v43, inf  ;;  %v1157_v62 = vand.u32 65535, %v2705_v8  ;;  %v3758_v43 = vld [vmem:[#allocation11_spill] sm:$0xff] }
 0x247   : > { %v674_v10 = vpop.xlane.xlu0 %673  ;;  %1135 = vmin.xlane.f32.xlu1 %v1134_v46  ;;  %v671_v12 = vpop.xlane.xlu2 %670 }
 0x248   : > { %vm3064_vm4 = vcmp.eq.f32.partialorder %v3754_v49, %v671_v12  ;;  %v1159_v9 = vcvt.s32.f32 %v1157_v62  ;;  %v3759_v12 = vand.u32 2147483647, %v2574_v24 }
 0x249   : > { %v755_v54 = vsel %vm3064_vm4, %v2466_v30, 32 }
 0x24a   : > { %v3087_v46 = vsel %vm605_vm2, %v755_v54, 2147483647  ;;  %vm3099_vm8 = vcmp.eq.f32.partialorder %v3759_v12, %v674_v10  ;;  %v1164_v25 = vsel %vm1163_vm6, %v1159_v9, inf }
 0x24b   : > { %v1083_v49 = vshra.s32 %v3087_v46, 16  ;;  %v756_v10 = vsel %vm3099_vm8, %v2466_v30, 32 }
 0x24c   : > { %v668_v16 = vpop.xlane.xlu1 %667 }
 0x24d   : > { %vm722_vm5 = vcmp.eq.f32.partialorder %v3757_v4, %v668_v16  ;;  %v1172_v4 = vand.u32 65535, %v2772_v31 }
 0x24e   : > { %v754_v23 = vsel %vm722_vm5, %v2466_v30, 32  ;;  %2113 = vmatmul.msk.f32.gmra.mxu1 %vm605_vm2, %v1322_v32  ;;  %2145 = vmatmul.msk.f32.gmra.mxu2 %vm605_vm2, %v1322_v32  ;;  %v1291_v32 = vmul.f32 %v2903_v61, %v3758_v43  ;;  %v1189_v43 = vcvt.s32.f32 %v1187_v50 }
 0x24f   : > { %v3074_v40 = vsel %vm605_vm2, %v754_v23, 2147483647  ;;  %v926_v42 = vpop.xlane.xlu0 %925  ;;  %970 = vmin.xlane.f32.xlu1 %v969_v38  ;;  %v3111_v56 = vpop.xlane.xlu2 %1011  ;;  %v3115_v23 = vcvt.s32.f32 %v1083_v49  ;;  %v3118_v38 = vsel %vm605_vm2, %v756_v10, 2147483647  ;;  %v1174_v62 = vcvt.s32.f32 %v1172_v4 }
 0x250   : > { %v927_v60 = vcvt.f32.s32 %v926_v42  ;;  %v1068_v39 = vshra.s32 %v3074_v40, 16  ;;  %vm1013_vm12 = vcmp.eq.f32.partialorder %v2854_v37, %v3111_v56 }
 0x251   : > { %v1179_v31 = vsel %vm1178_vm10, %v1174_v62, inf }
 0x252   : > { %v930_v48 = vadd.s32 %v929_v34, %v927_v60  ;;  %v3082_v57 = vcvt.s32.f32 %v1068_v39  ;;  %v1022_v60 = vand.u32 65535, %v2857_v11 }
 0x254   : > { %1597 = vst.msk [vmem:[%s2909_s22 + $0x50] sm:$0xff] %vm1586_vm11, %v930_v48  ;;  %1071 = vmin.xlane.f32.xlu0 %v3082_v57  ;;  %v3094_v8 = vpop.xlane.xlu1 %996  ;;  %vm1256_vm7 = vcmp.eq.s32.totalorder %v2466_v30, %v930_v48  ;;  %v1024_v48 = vcvt.s32.f32 %v1022_v60 }
 0x255   : > { %v1323_v16 = vsel %vm1256_vm7, %v1291_v32, 0.0  ;;  %vm998_vm9 = vcmp.eq.f32.partialorder %v2871_v22, %v3094_v8  ;;  %v1007_v22 = vand.u32 65535, %v2811_v29  ;;  %v1098_v29 = vshra.s32 %v3118_v38, 16 }
 0x256   : > { %2114 = vmatmul.msk.f32.gmra.mxu1 %vm605_vm2, %v1323_v16  ;;  %2146 = vmatmul.msk.f32.gmra.mxu2 %vm605_vm2, %v1323_v16  ;;  %v999_v6 = vsel %vm998_vm9, %v994_v7, inf  ;;  %v944_v7 = vshll.u32 %v943_v44, 16 }
 0x257   : > { %1165 = vmin.xlane.f32.xlu1 %v1164_v25  ;;  %1000 = vmin.xlane.f32.xlu2 %v999_v6  ;;  %v1009_v58 = vcvt.s32.f32 %v1007_v22  ;;  %v3128_v54 = vpop.xlane.xlu0 %1026  ;;  %v3132_v39 = vcvt.s32.f32 %v1098_v29  ;;  %v1202_v25 = vand.u32 65535, %v2923_v51  ;;  %v959_v22 = vshll.u32 %v958_v1, 16 }
 0x258   : > { %vm1028_vm13 = vcmp.eq.f32.partialorder %v2879_v17, %v3128_v54 }
 0x259   : > { %v1014_v34 = vsel %vm1013_vm12, %v1009_v58, inf  ;;  %v1029_v32 = vsel %vm1028_vm13, %v1024_v48, inf  ;;  %v1204_v49 = vcvt.s32.f32 %v1202_v25  ;;  %v1217_v58 = vand.u32 65535, %v2887_v28 }
 0x25a   : > { %v3764_v48 = vand.u32 2147483647, %v2586_v47 }
 0x25b   : > { %v1219_v50 = vcvt.s32.f32 %v1217_v58 }
 0x25c   : > { %1086 = vmin.xlane.f32.xlu0 %v3115_v23  ;;  %v3125_v42 = vpop.xlane.xlu1 %1191 }
 0x25d   : > { %vm1193_vm14 = vcmp.eq.f32.partialorder %v2884_v2, %v3125_v42  ;;  %v1292_v2 = vmul.f32 %v2903_v61, %v3762_v41 }
 0x25e   : > { %v1194_v11 = vsel %vm1193_vm14, %v1189_v43, inf }
 0x25f   : > { %1180 = vmin.xlane.f32.xlu1 %v1179_v31  ;;  %1015 = vmin.xlane.f32.xlu2 %v1014_v34  ;;  %v2189_v31 = vld [vmem:[%s2291_s9] sm:$0xff] }
 0x264   : > { %1101 = vmin.xlane.f32.xlu0 %v3132_v39  ;;  %v3139_v37 = vpop.xlane.xlu1 %1221 }
 0x265   : > { %vm1223_vm3 = vcmp.eq.f32.partialorder %v2891_v18, %v3139_v37 }
 0x267   : > { %1030 = vmin.xlane.f32.xlu2 %v1029_v32  ;;  %1195 = vmin.xlane.f32.xlu1 %v1194_v11 }
 0x26c   : > { %v941_v9 = vpop.xlane.xlu1 %940 }
 0x26d   : > { %v942_v17 = vcvt.f32.s32 %v941_v9  ;;  %v2190_v9 = vld [vmem:[%s2291_s9 + $0x8] sm:$0xff] }
 0x26f   : > { %v945_v12 = vadd.s32 %v944_v7, %v942_v17  ;;  %v1224_v17 = vsel %vm1223_vm3, %v1219_v50, inf }
 0x271   : > { %1598 = vst.msk [vmem:[%s2909_s22 + $0x58] sm:$0xff] %vm1586_vm11, %v945_v12  ;;  %vm1257_vm15 = vcmp.eq.s32.totalorder %v2466_v30, %v945_v12 }
 0x272   : > { %v1324_v16 = vsel %vm1257_vm15, %v1292_v2, 0.0 }
 0x273   : > { %2115 = vmatmul.msk.f32.gmra.mxu1 %vm605_vm2, %v1324_v16  ;;  %2147 = vmatmul.msk.f32.gmra.mxu2 %vm605_vm2, %v1324_v16  ;;  %v1037_v16 = vand.u32 65535, %v2952_v45  ;;  %v2191_v45 = vld [vmem:[%s2291_s9 + $0x10] sm:$0xff] }
 0x27a   : > { %v3157_v6 = vpop.xlane.xlu2 %1206 }
 0x27b   : > { %v1458_v10 = vpop.f32.mrf.mxu1  ;;  %vm1208_vm0 = vcmp.eq.f32.partialorder %v2933_v5, %v3157_v6  ;;  %v3763_v5 = vld [vmem:[#allocation13_spill] sm:$0xff] }
 0x27c   : > { %1554 = vst.msk [vmem:[%s3154_s27] sm:$0xff] %vm357_vm1, %v1458_v10  ;;  %v1209_v51 = vsel %vm1208_vm0, %v1204_v49, inf  ;;  %v1764_v34 = vsub.f32 %v1458_v10, %v2189_v31  ;;  %v1293_v29 = vmul.f32 %v2903_v61, %v3763_v5 }
 0x27d   : > { %v956_v4 = vpop.xlane.xlu0 %955  ;;  %1210 = vmin.xlane.f32.xlu1 %v1209_v51 }
 0x27e   : > { %v957_v62 = vcvt.f32.s32 %v956_v4  ;;  %v1796_v11 = vmul.f32 %v1764_v34, %v1764_v34  ;;  %v1039_v4 = vcvt.s32.f32 %v1037_v16  ;;  %v1232_v34 = vand.u32 65535, %v2970_v0 }
 0x280   : > { %v960_v13 = vadd.s32 %v959_v22, %v957_v62  ;;  %v1828_v25 = vsel %vm357_vm1, %v1796_v11, 0.0  ;;  %v3765_v11 = vld [vmem:[#allocation2_spill] sm:$0xff] }
 0x281   : > { %v1636_v60 = vpop.f32.mrf.mxu2 }
 0x282   : > { %1599 = vst.msk [vmem:[%s2909_s22 + $0x60] sm:$0xff] %vm1586_vm11, %v960_v13  ;;  %v677_v28 = vpop.xlane.xlu2 %676  ;;  %vm1258_vm4 = vcmp.eq.s32.totalorder %v2466_v30, %v960_v13 }
 0x283   : > { %1732 = vst.msk [vmem:[%s3169_s8] sm:$0xff] %vm1586_vm11, %v1636_v60  ;;  %vm725_vm5 = vcmp.eq.f32.partialorder %v3764_v48, %v677_v28  ;;  %v1461_v43 = vpop.f32.mrf.mxu1  ;;  %v1325_v32 = vsel %vm1258_vm4, %v1293_v29, 0.0  ;;  %v1153_v60 = vcvt.f32.s32 %v2992_v19  ;;  %v1234_v28 = vcvt.s32.f32 %v1232_v34 }
 0x284   : > { %v757_v44 = vsel %vm725_vm5, %v2466_v30, 32  ;;  %1555 = vst.msk [vmem:[%s3154_s27 + $0x8] sm:$0xff] %vm357_vm1, %v1461_v43  ;;  %v1765_v7 = vsub.f32 %v1461_v43, %v2190_v9  ;;  %2116 = vmatmul.msk.f32.gmra.mxu1 %vm605_vm2, %v1325_v32  ;;  %2148 = vmatmul.msk.f32.gmra.mxu2 %vm605_vm2, %v1325_v32  ;;  %v1306_v19 = vmul.f32 %v2903_v61, %v3765_v11  ;;  %v988_v34 = vcvt.f32.s32 %v3032_v33 }
 0x285   : > { %v3192_v12 = vsel %vm605_vm2, %v757_v44, 2147483647  ;;  %1225 = vmin.xlane.f32.xlu1 %v1224_v17  ;;  %v1154_v0 = vshll.u32 %v1153_v60, 16  ;;  %v1295_v33 = vmul.f32 %v2903_v61, %v2459_v20  ;;  %v1138_v20 = vcvt.f32.s32 %v3051_v26 }
 0x286   : > { %v1797_v41 = vmul.f32 %v1765_v7, %v1765_v7  ;;  %v1113_v2 = vshra.s32 %v3192_v12, 16  ;;  %v989_v60 = vshll.u32 %v988_v34, 16  ;;  %v1305_v26 = vmul.f32 %v2903_v61, %v2598_v55 }
 0x288   : > { %v1829_v1 = vsel %vm357_vm1, %v1797_v41, 0.0  ;;  %v3198_v49 = vcvt.s32.f32 %v1113_v2  ;;  %v1052_v41 = vand.u32 65535, %v3008_v15 }
 0x289   : > { %v1830_v10 = vadd.f32 %v1829_v1, %v1828_v25  ;;  %v1639_v18 = vpop.f32.mrf.mxu2 }
 0x28a   : > { %1733 = vst.msk [vmem:[%s3169_s8 + $0x8] sm:$0xff] %vm1586_vm11, %v1639_v18  ;;  %v3202_v51 = vpop.xlane.xlu2 %1041  ;;  %1116 = vmin.xlane.f32.xlu0 %v3198_v49 }
 0x28b   : > { %v1464_v22 = vpop.f32.mrf.mxu1  ;;  %vm1043_vm6 = vcmp.eq.f32.partialorder %v2967_v21, %v3202_v51 }
 0x28c   : > { %1556 = vst.msk [vmem:[%s3154_s27 + $0x10] sm:$0xff] %vm357_vm1, %v1464_v22  ;;  %v1766_v62 = vsub.f32 %v1464_v22, %v2191_v45  ;;  %v1044_v58 = vsel %vm1043_vm6, %v1039_v4, inf  ;;  %v2193_v4 = vld [vmem:[%s2291_s9 + $0x20] sm:$0xff] }
 0x28d   : > { %1045 = vmin.xlane.f32.xlu2 %v1044_v58 }
 0x28e   : > { %v1798_v31 = vmul.f32 %v1766_v62, %v1766_v62 }
 0x290   : > { %v1831_v13 = vsel %vm357_vm1, %v1798_v31, 0.0 }
 0x291   : > { %v1832_v5 = vadd.f32 %v1831_v13, %v1830_v10  ;;  %v1642_v29 = vpop.f32.mrf.mxu2  ;;  %v1054_v10 = vcvt.s32.f32 %v1052_v41 }
 0x292   : > { %1734 = vst.msk [vmem:[%s3169_s8 + $0x10] sm:$0xff] %vm1586_vm11, %v1642_v29  ;;  %v3215_v21 = vpop.xlane.xlu2 %1236 }
 0x293   : > { %vm1238_vm7 = vcmp.eq.f32.partialorder %v2987_v63, %v3215_v21  ;;  %v2192_v63 = vld [vmem:[%s2291_s9 + $0x18] sm:$0xff] }
 0x294   : > { %v1239_v50 = vsel %vm1238_vm7, %v1234_v28, inf }
 0x295   : > { %v1151_v48 = vpop.xlane.xlu0 %1150  ;;  %1240 = vmin.xlane.f32.xlu0 %v1239_v50 }
 0x296   : > { %v1152_v43 = vcvt.f32.s32 %v1151_v48 }
 0x298   : > { %v1155_v32 = vadd.s32 %v1154_v0, %v1152_v43 }
 0x29a   : > { %1612 = vst.msk [vmem:[%s2909_s22 + $0xc8] sm:$0xff] %vm1586_vm11, %v1155_v32  ;;  %vm1271_vm8 = vcmp.eq.s32.totalorder %v2466_v30, %v1155_v32 }
 0x29b   : > { %v1467_v44 = vpop.f32.mrf.mxu1  ;;  %v3224_v9 = vsel %vm1271_vm8, %v1306_v19, 0.0 }
 0x29c   : > { %1557 = vst.msk [vmem:[%s3154_s27 + $0x18] sm:$0xff] %vm357_vm1, %v1467_v44  ;;  %v1767_v7 = vsub.f32 %v1467_v44, %v2192_v63  ;;  %v2195_v44 = vld [vmem:[%s2291_s9 + $0x30] sm:$0xff] }
 0x29e   : > { %v1799_v17 = vmul.f32 %v1767_v7, %v1767_v7 }
 0x2a0   : > { %v1833_v2 = vsel %vm357_vm1, %v1799_v17, 0.0 }
 0x2a1   : > { %v1834_v16 = vadd.f32 %v1833_v2, %v1832_v5  ;;  %v1645_v25 = vpop.f32.mrf.mxu2 }
 0x2a2   : > { %1735 = vst.msk [vmem:[%s3169_s8 + $0x18] sm:$0xff] %vm1586_vm11, %v1645_v25  ;;  %v3233_v1 = vpop.xlane.xlu0 %1056  ;;  %v1139_v25 = vshll.u32 %v1138_v20, 16 }
 0x2a3   : > { %v1470_v18 = vpop.f32.mrf.mxu1  ;;  %vm1058_vm9 = vcmp.eq.f32.partialorder %v3013_v59, %v3233_v1  ;;  %v2194_v59 = vld [vmem:[%s2291_s9 + $0x28] sm:$0xff] }
 0x2a4   : > { %1558 = vst.msk [vmem:[%s3154_s27 + $0x20] sm:$0xff] %vm357_vm1, %v1470_v18  ;;  %v1768_v15 = vsub.f32 %v1470_v18, %v2193_v4  ;;  %v1059_v22 = vsel %vm1058_vm9, %v1054_v10, inf  ;;  %v2196_v4 = vld [vmem:[%s2291_s9 + $0x38] sm:$0xff] }
 0x2a5   : > { %1060 = vmin.xlane.f32.xlu1 %v1059_v22 }
 0x2a6   : > { %v1800_v45 = vmul.f32 %v1768_v15, %v1768_v15 }
 0x2a8   : > { %v1835_v62 = vsel %vm357_vm1, %v1800_v45, 0.0 }
 0x2a9   : > { %v1836_v58 = vadd.f32 %v1835_v62, %v1834_v16  ;;  %v1648_v31 = vpop.f32.mrf.mxu2  ;;  %v973_v62 = vcvt.f32.s32 %v2959_v27 }
 0x2aa   : > { %1736 = vst.msk [vmem:[%s3169_s8 + $0x20] sm:$0xff] %vm1586_vm11, %v1648_v31 }
 0x2ab   : > { %v1473_v13 = vpop.f32.mrf.mxu1 }
 0x2ac   : > { %1559 = vst.msk [vmem:[%s3154_s27 + $0x28] sm:$0xff] %vm357_vm1, %v1473_v13  ;;  %v1769_v5 = vsub.f32 %v1473_v13, %v2194_v59  ;;  %v974_v59 = vshll.u32 %v973_v62, 16  ;;  %v1296_v62 = vmul.f32 %v2903_v61, %v2470_v35 }
 0x2ad   : > { %v986_v29 = vpop.xlane.xlu2 %985 }
 0x2ae   : > { %v1801_v28 = vmul.f32 %v1769_v5, %v1769_v5  ;;  %v987_v50 = vcvt.f32.s32 %v986_v29  ;;  %v1067_v29 = vand.u32 65535, %v3074_v40 }
 0x2b0   : > { %v1837_v48 = vsel %vm357_vm1, %v1801_v28, 0.0  ;;  %v990_v0 = vadd.s32 %v989_v60, %v987_v50  ;;  %v2197_v60 = vld [vmem:[%s2291_s9 + $0x40] sm:$0xff]  ;;  %v1069_v40 = vcvt.s32.f32 %v1067_v29 }
 0x2b1   : > { %v1838_v43 = vadd.f32 %v1837_v48, %v1836_v58  ;;  %v1651_v32 = vpop.f32.mrf.mxu2  ;;  %v3766_v48 = vld [vmem:[#allocation14_spill] sm:$0xff] }
 0x2b2   : > { %1601 = vst.msk [vmem:[%s2909_s22 + $0x70] sm:$0xff] %vm1586_vm11, %v990_v0  ;;  %vm1260_vm10 = vcmp.eq.s32.totalorder %v2466_v30, %v990_v0  ;;  %v1294_v0 = vmul.f32 %v2903_v61, %v3766_v48 }
 0x2b3   : > { %1737 = vst.msk [vmem:[%s3169_s8 + $0x28] sm:$0xff] %vm1586_vm11, %v1651_v32  ;;  %v1476_v11 = vpop.f32.mrf.mxu1  ;;  %v3255_v19 = vsel %vm1260_vm10, %v1295_v33, 0.0  ;;  %v1168_v33 = vcvt.f32.s32 %v2972_v14  ;;  %v1003_v32 = vcvt.f32.s32 %v3094_v8 }
 0x2b4   : > { %1560 = vst.msk [vmem:[%s3154_s27 + $0x30] sm:$0xff] %vm357_vm1, %v1476_v11  ;;  %v1770_v63 = vsub.f32 %v1476_v11, %v2195_v44 }
 0x2b5   : > { %v1169_v20 = vshll.u32 %v1168_v33, 16 }
 0x2b6   : > { %v1802_v7 = vmul.f32 %v1770_v63, %v1770_v63 }
 0x2b8   : > { %v1839_v17 = vsel %vm357_vm1, %v1802_v7, 0.0 }
 0x2b9   : > { %v1840_v41 = vadd.f32 %v1839_v17, %v1838_v43  ;;  %v1654_v2 = vpop.f32.mrf.mxu2 }
 0x2ba   : > { %1738 = vst.msk [vmem:[%s3169_s8 + $0x30] sm:$0xff] %vm1586_vm11, %v1654_v2  ;;  %v1136_v16 = vpop.xlane.xlu1 %1135 }
 0x2bb   : > { %v1137_v10 = vcvt.f32.s32 %v1136_v16  ;;  %v1479_v18 = vpop.f32.mrf.mxu1 }
 0x2bc   : > { %1561 = vst.msk [vmem:[%s3154_s27 + $0x38] sm:$0xff] %vm357_vm1, %v1479_v18  ;;  %v1771_v15 = vsub.f32 %v1479_v18, %v2196_v4  ;;  %v2198_v18 = vld [vmem:[%s2291_s9 + $0x48] sm:$0xff] }
 0x2bd   : > { %v1140_v22 = vadd.s32 %v1139_v25, %v1137_v10  ;;  %v1082_v10 = vand.u32 65535, %v3087_v46 }
 0x2be   : > { %v1803_v45 = vmul.f32 %v1771_v15, %v1771_v15 }
 0x2bf   : > { %1611 = vst.msk [vmem:[%s2909_s22 + $0xc0] sm:$0xff] %vm1586_vm11, %v1140_v22  ;;  %vm1270_vm12 = vcmp.eq.s32.totalorder %v2466_v30, %v1140_v22 }
 0x2c0   : > { %v1841_v58 = vsel %vm357_vm1, %v1803_v45, 0.0  ;;  %v3274_v31 = vsel %vm1270_vm12, %v1305_v26, 0.0  ;;  %v3767_v26 = vld [vmem:[#allocation3_spill] sm:$0xff] }
 0x2c1   : > { %v1842_v34 = vadd.f32 %v1841_v58, %v1840_v41  ;;  %2128 = vmatmul.msk.f32.vlgmr.msrb.gmra.mxu3 %vm605_vm2, %v3274_v31  ;;  %v1657_v13 = vpop.f32.mrf.mxu2  ;;  %v1307_v45 = vmul.f32 %v2903_v61, %v3767_v26  ;;  %v1183_v58 = vcvt.f32.s32 %v3044_v52 }
 0x2c2   : > { %1739 = vst.msk [vmem:[%s3169_s8 + $0x38] sm:$0xff] %vm1586_vm11, %v1657_v13  ;;  %v971_v55 = vpop.xlane.xlu1 %970  ;;  %v1018_v13 = vcvt.f32.s32 %v3111_v56 }
 0x2c3   : > { %v972_v5 = vcvt.f32.s32 %v971_v55  ;;  %v1482_v27 = vpop.f32.mrf.mxu1  ;;  %v1084_v55 = vcvt.s32.f32 %v1082_v10 }
 0x2c4   : > { %1562 = vst.msk [vmem:[%s3154_s27 + $0x40] sm:$0xff] %vm357_vm1, %v1482_v27  ;;  %v1772_v28 = vsub.f32 %v1482_v27, %v2197_v60  ;;  %v1097_v60 = vand.u32 65535, %v3118_v38 }
 0x2c5   : > { %v975_v50 = vadd.s32 %v974_v59, %v972_v5 }
 0x2c6   : > { %v1804_v43 = vmul.f32 %v1772_v28, %v1772_v28  ;;  %v1184_v28 = vshll.u32 %v1183_v58, 16 }
 0x2c7   : > { %1600 = vst.msk [vmem:[%s2909_s22 + $0x68] sm:$0xff] %vm1586_vm11, %v975_v50  ;;  %v3290_v11 = vpop.xlane.xlu0 %1071  ;;  %vm1259_vm13 = vcmp.eq.s32.totalorder %v2466_v30, %v975_v50  ;;  %v1019_v50 = vshll.u32 %v1018_v13, 16 }
 0x2c8   : > { %v1843_v44 = vsel %vm357_vm1, %v1804_v43, 0.0  ;;  %v1326_v63 = vsel %vm1259_vm13, %v1294_v0, 0.0  ;;  %vm1073_vm14 = vcmp.eq.f32.partialorder %v3082_v57, %v3290_v11  ;;  %v1004_v57 = vshll.u32 %v1003_v32, 16  ;;  %v2199_v43 = vld [vmem:[%s2291_s9 + $0x50] sm:$0xff] }
 0x2c9   : > { %v1844_v7 = vadd.f32 %v1843_v44, %v1842_v34  ;;  %2117 = vmatmul.msk.f32.gmra.mxu1 %vm605_vm2, %v1326_v63  ;;  %2129 = vmatmul.msk.f32.gmra.mxu3 %vm605_vm2, %v3224_v9  ;;  %v1660_v14 = vpop.f32.mrf.mxu2  ;;  %v1074_v8 = vsel %vm1073_vm14, %v1069_v40, inf }
 0x2ca   : > { %1740 = vst.msk [vmem:[%s3169_s8 + $0x40] sm:$0xff] %vm1586_vm11, %v1660_v14  ;;  %2149 = vmatmul.msk.f32.gmra.mxu2 %vm605_vm2, %v1326_v63  ;;  %1075 = vmin.xlane.f32.xlu2 %v1074_v8  ;;  %v1001_v17 = vpop.xlane.xlu2 %1000  ;;  %v1166_v41 = vpop.xlane.xlu1 %1165  ;;  %v3768_v63 = vld [vmem:[#allocation4_spill] sm:$0xff]  ;;  %v1099_v8 = vcvt.s32.f32 %v1097_v60 }
 0x2cb   : > { %v1002_v2 = vcvt.f32.s32 %v1001_v17  ;;  %v1167_v16 = vcvt.f32.s32 %v1166_v41  ;;  %v1485_v25 = vpop.f32.mrf.mxu1  ;;  %v1198_v17 = vcvt.f32.s32 %v3125_v42 }
 0x2cc   : > { %1563 = vst.msk [vmem:[%s3154_s27 + $0x48] sm:$0xff] %vm357_vm1, %v1485_v25  ;;  %v1773_v4 = vsub.f32 %v1485_v25, %v2198_v18 }
 0x2cd   : > { %v1005_v15 = vadd.s32 %v1004_v57, %v1002_v2  ;;  %v1170_v22 = vadd.s32 %v1169_v20, %v1167_v16  ;;  %v1033_v20 = vcvt.f32.s32 %v3128_v54 }
 0x2ce   : > { %v1805_v34 = vmul.f32 %v1773_v4, %v1773_v4 }
 0x2cf   : > { %1602 = vst.msk [vmem:[%s2909_s22 + $0x78] sm:$0xff] %vm1586_vm11, %v1005_v15  ;;  %v3314_v46 = vpop.xlane.xlu0 %1086  ;;  %vm1272_vm15 = vcmp.eq.s32.totalorder %v2466_v30, %v1170_v22  ;;  %vm1261_vm0 = vcmp.eq.s32.totalorder %v2466_v30, %v1005_v15  ;;  %v1034_v4 = vshll.u32 %v1033_v20, 16 }
 0x2d0   : > { %1613 = vst.msk [vmem:[%s2909_s22 + $0xd0] sm:$0xff] %vm1586_vm11, %v1170_v22  ;;  %v1845_v59 = vsel %vm357_vm1, %v1805_v34, 0.0  ;;  %v3321_v35 = vsel %vm1272_vm15, %v1307_v45, 0.0  ;;  %vm1088_vm3 = vcmp.eq.f32.partialorder %v3115_v23, %v3314_v46  ;;  %v1328_v27 = vsel %vm1261_vm0, %v1296_v62, 0.0  ;;  %v3770_v62 = vld [vmem:[#allocation17_spill] sm:$0xff]  ;;  %v3771_v34 = vld [vmem:[#allocation16_spill] sm:$0xff] }
 0x2d1   : > { %v1846_v52 = vadd.f32 %v1845_v59, %v1844_v7  ;;  %2118 = vmatmul.msk.f32.gmra.mxu1 %vm605_vm2, %v3255_v19  ;;  %2130 = vmatmul.msk.f32.gmra.mxu3 %vm605_vm2, %v3321_v35  ;;  %v1663_v56 = vpop.f32.mrf.mxu2  ;;  %v1089_v5 = vsel %vm1088_vm3, %v1084_v55, inf  ;;  %v3769_v7 = vld [vmem:[#allocation15_spill] sm:$0xff]  ;;  %v1298_v58 = vmul.f32 %v2903_v61, %v3770_v62  ;;  %v1309_v13 = vmul.f32 %v2903_v61, %v3771_v34  ;;  %v3775_v62 = vld [vmem:[#allocation21_spill] sm:$0xff] }
 0x2d2   : > { %1741 = vst.msk [vmem:[%s3169_s8 + $0x48] sm:$0xff] %vm1586_vm11, %v1663_v56  ;;  %2150 = vmatmul.msk.f32.gmra.mxu2 %vm605_vm2, %v3255_v19  ;;  %1090 = vmin.xlane.f32.xlu0 %v1089_v5  ;;  %v1016_v29 = vpop.xlane.xlu2 %1015  ;;  %v1181_v23 = vpop.xlane.xlu1 %1180  ;;  %v1308_v19 = vmul.f32 %v2903_v61, %v3768_v63  ;;  %v1297_v14 = vmul.f32 %v2903_v61, %v3769_v7  ;;  %v1213_v61 = vcvt.f32.s32 %v3157_v6  ;;  %v1228_v6 = vcvt.f32.s32 %v3139_v37 }
 0x2d3   : > { %v1017_v48 = vcvt.f32.s32 %v1016_v29  ;;  %v1182_v0 = vcvt.f32.s32 %v1181_v23  ;;  %v1488_v33 = vpop.f32.mrf.mxu1  ;;  %v1063_v34 = vcvt.f32.s32 %v3233_v1 }
 0x2d4   : > { %1564 = vst.msk [vmem:[%s3154_s27 + $0x50] sm:$0xff] %vm357_vm1, %v1488_v33  ;;  %v1774_v32 = vsub.f32 %v1488_v33, %v2199_v43  ;;  %v1214_v5 = vshll.u32 %v1213_v61, 16  ;;  %v1229_v63 = vshll.u32 %v1228_v6, 16  ;;  %v2203_v6 = vld [vmem:[%s2291_s9 + $0x68] sm:$0xff] }
 0x2d5   : > { %v1020_v40 = vadd.s32 %v1019_v50, %v1017_v48  ;;  %v1185_v44 = vadd.s32 %v1184_v28, %v1182_v0  ;;  %v3387_v50 = vld [vmem:[%s3658_s3] ss:$0 sm:$0xff]  ;;  %v3772_v48 = vld [vmem:[#allocation19_spill] sm:$0xff] }
 0x2d6   : > { %v1806_v38 = vmul.f32 %v1774_v32, %v1774_v32  ;;  %v1310_v0 = vmul.f32 %v3387_v50, %v3772_v48 }
 0x2d7   : > { %1603 = vst.msk [vmem:[%s2909_s22 + $0x80] sm:$0xff] %vm1586_vm11, %v1020_v40  ;;  %v3345_v41 = vpop.xlane.xlu0 %1101  ;;  %vm1273_vm4 = vcmp.eq.s32.totalorder %v2466_v30, %v1185_v44  ;;  %vm1262_vm5 = vcmp.eq.s32.totalorder %v2466_v30, %v1020_v40 }
 0x2d8   : > { %1614 = vst.msk [vmem:[%s2909_s22 + $0xd8] sm:$0xff] %vm1586_vm11, %v1185_v44  ;;  %v1847_v57 = vsel %vm357_vm1, %v1806_v38, 0.0  ;;  %v3352_v2 = vsel %vm1273_vm4, %v1308_v19, 0.0  ;;  %vm1103_vm6 = vcmp.eq.f32.partialorder %v3132_v39, %v3345_v41  ;;  %v1329_v25 = vsel %vm1262_vm5, %v1297_v14, 0.0  ;;  %v3773_v14 = vld [vmem:[#allocation20_spill] sm:$0xff] }
 0x2d9   : > { %v1848_v54 = vadd.f32 %v1847_v57, %v1846_v52  ;;  %2119 = vmatmul.msk.f32.gmra.mxu1 %vm605_vm2, %v1328_v27  ;;  %2131 = vmatmul.msk.f32.gmra.mxu3 %vm605_vm2, %v3352_v2  ;;  %v1666_v42 = vpop.f32.mrf.mxu2  ;;  %v1104_v16 = vsel %vm1103_vm6, %v1099_v8, inf  ;;  %v1199_v39 = vshll.u32 %v1198_v17, 16  ;;  %v1112_v19 = vand.u32 65535, %v3192_v12 }
 0x2da   : > { %1742 = vst.msk [vmem:[%s3169_s8 + $0x50] sm:$0xff] %vm1586_vm11, %v1666_v42  ;;  %2151 = vmatmul.msk.f32.gmra.mxu2 %vm605_vm2, %v1328_v27  ;;  %v1031_v10 = vpop.xlane.xlu2 %1030  ;;  %1105 = vmin.xlane.f32.xlu1 %v1104_v16  ;;  %v1196_v18 = vpop.xlane.xlu1 %1195  ;;  %v2200_v27 = vld [vmem:[%s2291_s9 + $0x58] sm:$0xff]  ;;  %v1311_v38 = vmul.f32 %v3387_v50, %v3773_v14  ;;  %v1048_v8 = vcvt.f32.s32 %v3202_v51 }
 0x2db   : > { %v1032_v15 = vcvt.f32.s32 %v1031_v10  ;;  %v1197_v22 = vcvt.f32.s32 %v1196_v18  ;;  %v1114_v17 = vcvt.s32.f32 %v1112_v19  ;;  %v3774_v10 = vld [vmem:[#allocation18_spill] sm:$0xff] }
 0x2dc   : > { %v1299_v18 = vmul.f32 %v3387_v50, %v3774_v10 }
 0x2dd   : > { %v1035_v26 = vadd.s32 %v1034_v4, %v1032_v15  ;;  %v1200_v45 = vadd.s32 %v1199_v39, %v1197_v22  ;;  %v1243_v4 = vcvt.f32.s32 %v3215_v21  ;;  %v1312_v21 = vmul.f32 %v3387_v50, %v3775_v62 }
 0x2df   : > { %1604 = vst.msk [vmem:[%s2909_s22 + $0x88] sm:$0xff] %vm1586_vm11, %v1035_v26  ;;  %vm1274_vm7 = vcmp.eq.s32.totalorder %v2466_v30, %v1200_v45  ;;  %vm1263_vm8 = vcmp.eq.s32.totalorder %v2466_v30, %v1035_v26  ;;  %v1244_v22 = vshll.u32 %v1243_v4, 16 }
 0x2e0   : > { %1615 = vst.msk [vmem:[%s2909_s22 + $0xe0] sm:$0xff] %vm1586_vm11, %v1200_v45  ;;  %v3372_v55 = vsel %vm1274_vm7, %v1309_v13, 0.0  ;;  %v1330_v59 = vsel %vm1263_vm8, %v1298_v58, 0.0 }
 0x2e1   : > { %2120 = vmatmul.msk.f32.gmra.mxu1 %vm605_vm2, %v1329_v25  ;;  %2132 = vmatmul.msk.f32.gmra.mxu3 %vm605_vm2, %v3372_v55 }
 0x2e2   : > { %2152 = vmatmul.msk.f32.gmra.mxu2 %vm605_vm2, %v1329_v25 }
 0x2e9   : > { %2121 = vmatmul.msk.f32.gmra.mxu1 %vm605_vm2, %v1330_v59 }
 0x2ea   : > { %2153 = vmatmul.msk.f32.gmra.mxu2 %vm605_vm2, %v1330_v59  ;;  %v1064_v59 = vshll.u32 %v1063_v34, 16 }
 0x2f0   : > { %v1491_v52 = vpop.f32.mrf.mxu1  ;;  %v1211_v56 = vpop.xlane.xlu1 %1210 }
 0x2f1   : > { %1565 = vst.msk [vmem:[%s3154_s27 + $0x58] sm:$0xff] %vm357_vm1, %v1491_v52  ;;  %v1775_v29 = vsub.f32 %v1491_v52, %v2200_v27  ;;  %v1212_v23 = vcvt.f32.s32 %v1211_v56  ;;  %v1300_v56 = vmul.f32 %v3387_v50, %v2528_v36  ;;  %v1078_v36 = vcvt.f32.s32 %v3290_v11 }
 0x2f3   : > { %v1807_v60 = vmul.f32 %v1775_v29, %v1775_v29  ;;  %v1215_v28 = vadd.s32 %v1214_v5, %v1212_v23  ;;  %v2202_v29 = vld [vmem:[%s2291_s9 + $0x60] sm:$0xff] }
 0x2f5   : > { %v1849_v33 = vsel %vm357_vm1, %v1807_v60, 0.0  ;;  %1616 = vst.msk [vmem:[%s2909_s22 + $0xe8] sm:$0xff] %vm1586_vm11, %v1215_v28  ;;  %vm1275_vm9 = vcmp.eq.s32.totalorder %v2466_v30, %v1215_v28 }
 0x2f6   : > { %v3396_v43 = vadd.f32 %v1849_v33, %v1848_v54  ;;  %v1669_v32 = vpop.f32.mrf.mxu2  ;;  %v3398_v40 = vsel %vm1275_vm9, %v1310_v0, 0.0  ;;  %v1049_v54 = vshll.u32 %v1048_v8, 16 }
 0x2f7   : > { %1743 = vst.msk [vmem:[%s3169_s8 + $0x58] sm:$0xff] %vm1586_vm11, %v1669_v32  ;;  %2133 = vmatmul.msk.f32.gmra.mxu3 %vm605_vm2, %v3398_v40 }
 0x2f8   : > { %v1226_v44 = vpop.xlane.xlu1 %1225 }
 0x2f9   : > { %v1227_v37 = vcvt.f32.s32 %v1226_v44 }
 0x2fb   : > { %v1230_v7 = vadd.s32 %v1229_v63, %v1227_v37  ;;  %v1108_v63 = vcvt.f32.s32 %v3345_v41 }
 0x2fd   : > { %1617 = vst.msk [vmem:[%s2909_s22 + $0xf0] sm:$0xff] %vm1586_vm11, %v1230_v7  ;;  %v3410_v20 = vpop.xlane.xlu0 %1116  ;;  %vm1276_vm10 = vcmp.eq.s32.totalorder %v2466_v30, %v1230_v7 }
 0x2fe   : > { %v3413_v57 = vsel %vm1276_vm10, %v1311_v38, 0.0  ;;  %vm1118_vm12 = vcmp.eq.f32.partialorder %v3198_v49, %v3410_v20 }
 0x2ff   : > { %2134 = vmatmul.msk.f32.gmra.mxu3 %vm605_vm2, %v3413_v57  ;;  %v1119_v12 = vsel %vm1118_vm12, %v1114_v17, inf }
 0x300   : > { %1120 = vmin.xlane.f32.xlu2 %v1119_v12  ;;  %v1046_v51 = vpop.xlane.xlu2 %1045 }
 0x301   : > { %v1047_v42 = vcvt.f32.s32 %v1046_v51  ;;  %v1494_v16 = vpop.f32.mrf.mxu1 }
 0x302   : > { %1566 = vst.msk [vmem:[%s3154_s27 + $0x60] sm:$0xff] %vm357_vm1, %v1494_v16  ;;  %v1776_v23 = vsub.f32 %v1494_v16, %v2202_v29 }
 0x303   : > { %v1050_v25 = vadd.s32 %v1049_v54, %v1047_v42  ;;  %v1303_v54 = vmul.f32 %v3387_v50, %v2574_v24 }
 0x304   : > { %v1808_v11 = vmul.f32 %v1776_v23, %v1776_v23 }
 0x305   : > { %1605 = vst.msk [vmem:[%s2909_s22 + $0x90] sm:$0xff] %vm1586_vm11, %v1050_v25  ;;  %vm1264_vm13 = vcmp.eq.s32.totalorder %v2466_v30, %v1050_v25 }
 0x306   : > { %v1331_v49 = vsel %vm1264_vm13, %v1299_v18, 0.0  ;;  %v1851_v0 = vsel %vm357_vm1, %v1808_v11, 0.0 }
 0x307   : > { %2122 = vmatmul.msk.f32.gmra.mxu1 %vm605_vm2, %v1331_v49  ;;  %v1672_v39 = vpop.f32.mrf.mxu2  ;;  %2154 = vmatmul.msk.f32.gmra.mxu2 %vm605_vm2, %v1331_v49  ;;  %v1852_v37 = vadd.f32 %v1851_v0, %v3396_v43  ;;  %v1109_v43 = vshll.u32 %v1108_v63, 16  ;;  %v2205_v49 = vld [vmem:[%s2291_s9 + $0x78] sm:$0xff] }
 0x308   : > { %1744 = vst.msk [vmem:[%s3169_s8 + $0x60] sm:$0xff] %vm1586_vm11, %v1672_v39  ;;  %v1241_v15 = vpop.xlane.xlu0 %1240  ;;  %v2209_v63 = vld [vmem:[%s2291_s9 + $0x98] sm:$0xff] }
 0x309   : > { %v1242_v26 = vcvt.f32.s32 %v1241_v15 }
 0x30b   : > { %v1245_v45 = vadd.s32 %v1244_v22, %v1242_v26 }
 0x30d   : > { %1618 = vst.msk [vmem:[%s2909_s22 + $0xf8] sm:$0xff] %vm1586_vm11, %v1245_v45  ;;  %vm1277_vm14 = vcmp.eq.s32.totalorder %v2466_v30, %v1245_v45 }
 0x30e   : > { %v3436_v58 = vsel %vm1277_vm14, %v1312_v21, 0.0 }
 0x30f   : > { %2135 = vmatmul.msk.f32.gmra.mxu3 %vm605_vm2, %v3436_v58 }
 0x317   : > { %2160 = vmatmul.msk.f32.vlgmr.msra.gmra.mxu3 %vm605_vm2, %v3274_v31  ;;  %v1079_v31 = vshll.u32 %v1078_v36, 16  ;;  %v2207_v36 = vld [vmem:[%s2291_s9 + $0x88] sm:$0xff] }
 0x318   : > { %v1061_v13 = vpop.xlane.xlu1 %1060 }
 0x319   : > { %v1062_v61 = vcvt.f32.s32 %v1061_v13 }
 0x31b   : > { %v1065_v52 = vadd.s32 %v1064_v59, %v1062_v61 }
 0x31d   : > { %1606 = vst.msk [vmem:[%s2909_s22 + $0x98] sm:$0xff] %vm1586_vm11, %v1065_v52  ;;  %vm1265_vm15 = vcmp.eq.s32.totalorder %v2466_v30, %v1065_v52 }
 0x31e   : > { %v1332_v5 = vsel %vm1265_vm15, %v1300_v56, 0.0 }
 0x31f   : > { %2123 = vmatmul.msk.f32.gmra.mxu1 %vm605_vm2, %v1332_v5  ;;  %2155 = vmatmul.msk.f32.gmra.mxu2 %vm605_vm2, %v1332_v5 }
 0x320   : > { %2161 = vmatmul.msk.f32.gmra.mxu3 %vm605_vm2, %v3224_v9  ;;  %v1301_v9 = vmul.f32 %v3387_v50, %v2548_v3 }
 0x328   : > { %2162 = vmatmul.msk.f32.gmra.mxu3 %vm605_vm2, %v3321_v35  ;;  %v1093_v35 = vcvt.f32.s32 %v3314_v46 }
 0x32a   : > { %v1094_v28 = vshll.u32 %v1093_v35, 16 }
 0x330   : > { %2163 = vmatmul.msk.f32.gmra.mxu3 %vm605_vm2, %v3352_v2 }
 0x338   : > { %2164 = vmatmul.msk.f32.gmra.mxu3 %vm605_vm2, %v3372_v55 }
 0x33d   : > { %v1076_v1 = vpop.xlane.xlu2 %1075 }
 0x33e   : > { %v1077_v27 = vcvt.f32.s32 %v1076_v1 }
 0x340   : > { %v1080_v60 = vadd.s32 %v1079_v31, %v1077_v27  ;;  %2165 = vmatmul.msk.f32.gmra.mxu3 %vm605_vm2, %v3398_v40  ;;  %v1302_v40 = vmul.f32 %v3387_v50, %v2562_v53 }
 0x342   : > { %1607 = vst.msk [vmem:[%s2909_s22 + $0xa0] sm:$0xff] %vm1586_vm11, %v1080_v60  ;;  %vm1266_vm0 = vcmp.eq.s32.totalorder %v2466_v30, %v1080_v60  ;;  %v1123_v60 = vcvt.f32.s32 %v3410_v20 }
 0x343   : > { %v1333_v2 = vsel %vm1266_vm0, %v1301_v9, 0.0 }
 0x344   : > { %2124 = vmatmul.msk.f32.gmra.mxu1 %vm605_vm2, %v1333_v2  ;;  %v3469_v55 = vpop.f32.mrf.mxu3  ;;  %2156 = vmatmul.msk.f32.gmra.mxu2 %vm605_vm2, %v1333_v2  ;;  %v1124_v35 = vshll.u32 %v1123_v60, 16 }
 0x345   : > { %1578 = vst.msk [vmem:[%s3154_s27 + $0xc0] sm:$0xff] %vm357_vm1, %v3469_v55  ;;  %v1091_v3 = vpop.xlane.xlu0 %1090 }
 0x346   : > { %v1092_v48 = vcvt.f32.s32 %v1091_v3  ;;  %v1497_v46 = vpop.f32.mrf.mxu1  ;;  %v1304_v3 = vmul.f32 %v3387_v50, %v2586_v47  ;;  %v2208_v47 = vld [vmem:[%s2291_s9 + $0x90] sm:$0xff] }
 0x347   : > { %1567 = vst.msk [vmem:[%s3154_s27 + $0x68] sm:$0xff] %vm357_vm1, %v1497_v46  ;;  %v1777_v33 = vsub.f32 %v1497_v46, %v2203_v6 }
 0x348   : > { %v1095_v32 = vadd.s32 %v1094_v28, %v1092_v48  ;;  %2166 = vmatmul.msk.f32.gmra.mxu3 %vm605_vm2, %v3413_v57  ;;  %v2204_v57 = vld [vmem:[%s2291_s9 + $0x70] sm:$0xff] }
 0x349   : > { %v1809_v44 = vmul.f32 %v1777_v33, %v1777_v33 }
 0x34a   : > { %1608 = vst.msk [vmem:[%s2909_s22 + $0xa8] sm:$0xff] %vm1586_vm11, %v1095_v32  ;;  %vm1267_vm3 = vcmp.eq.s32.totalorder %v2466_v30, %v1095_v32 }
 0x34b   : > { %v1853_v19 = vsel %vm357_vm1, %v1809_v44, 0.0  ;;  %v1334_v7 = vsel %vm1267_vm3, %v1302_v40, 0.0 }
 0x34c   : > { %v1854_v14 = vadd.f32 %v1853_v19, %v1852_v37  ;;  %2125 = vmatmul.msk.f32.gmra.mxu1 %vm605_vm2, %v1334_v7  ;;  %v3490_v38 = vpop.f32.mrf.mxu3  ;;  %2157 = vmatmul.msk.f32.gmra.mxu2 %vm605_vm2, %v1334_v7 }
 0x34d   : > { %1579 = vst.msk [vmem:[%s3154_s27 + $0xc8] sm:$0xff] %vm357_vm1, %v3490_v38  ;;  %v1675_v53 = vpop.f32.mrf.mxu2  ;;  %v1106_v41 = vpop.xlane.xlu1 %1105 }
 0x34e   : > { %1745 = vst.msk [vmem:[%s3169_s8 + $0x68] sm:$0xff] %vm1586_vm11, %v1675_v53  ;;  %v1107_v8 = vcvt.f32.s32 %v1106_v41  ;;  %v1500_v17 = vpop.f32.mrf.mxu1 }
 0x34f   : > { %1568 = vst.msk [vmem:[%s3154_s27 + $0x70] sm:$0xff] %vm357_vm1, %v1500_v17  ;;  %v1778_v12 = vsub.f32 %v1500_v17, %v2204_v57 }
 0x350   : > { %v1110_v51 = vadd.s32 %v1109_v43, %v1107_v8  ;;  %2167 = vmatmul.msk.f32.gmra.mxu3 %vm605_vm2, %v3436_v58  ;;  %v2206_v58 = vld [vmem:[%s2291_s9 + $0x80] sm:$0xff] }
 0x351   : > { %v1810_v42 = vmul.f32 %v1778_v12, %v1778_v12 }
 0x352   : > { %1609 = vst.msk [vmem:[%s2909_s22 + $0xb0] sm:$0xff] %vm1586_vm11, %v1110_v51  ;;  %vm1268_vm4 = vcmp.eq.s32.totalorder %v2466_v30, %v1110_v51 }
 0x353   : > { %v1855_v16 = vsel %vm357_vm1, %v1810_v42, 0.0  ;;  %v1335_v25 = vsel %vm1268_vm4, %v1303_v54, 0.0 }
 0x354   : > { %v1856_v10 = vadd.f32 %v1855_v16, %v1854_v14  ;;  %2126 = vmatmul.msk.f32.gmra.mxu1 %vm605_vm2, %v1335_v25  ;;  %v3510_v18 = vpop.f32.mrf.mxu3  ;;  %2158 = vmatmul.msk.f32.gmra.mxu2 %vm605_vm2, %v1335_v25 }
 0x355   : > { %1580 = vst.msk [vmem:[%s3154_s27 + $0xd0] sm:$0xff] %vm357_vm1, %v3510_v18  ;;  %v1678_v24 = vpop.f32.mrf.mxu2 }
 0x356   : > { %1746 = vst.msk [vmem:[%s3169_s8 + $0x70] sm:$0xff] %vm1586_vm11, %v1678_v24  ;;  %v1503_v4 = vpop.f32.mrf.mxu1 }
 0x357   : > { %1569 = vst.msk [vmem:[%s3154_s27 + $0x78] sm:$0xff] %vm357_vm1, %v1503_v4  ;;  %v1779_v39 = vsub.f32 %v1503_v4, %v2205_v49  ;;  %v2210_v4 = vld [vmem:[%s2291_s9 + $0xa0] sm:$0xff] }
 0x359   : > { %v1811_v15 = vmul.f32 %v1779_v39, %v1779_v39  ;;  %v2211_v39 = vld [vmem:[%s2291_s9 + $0xa8] sm:$0xff] }
 0x35b   : > { %v1857_v22 = vsel %vm357_vm1, %v1811_v15, 0.0 }
 0x35c   : > { %v1858_v26 = vadd.f32 %v1857_v22, %v1856_v10  ;;  %v3522_v45 = vpop.f32.mrf.mxu3 }
 0x35d   : > { %1581 = vst.msk [vmem:[%s3154_s27 + $0xd8] sm:$0xff] %vm357_vm1, %v3522_v45  ;;  %v1681_v62 = vpop.f32.mrf.mxu2 }
 0x35e   : > { %1747 = vst.msk [vmem:[%s3169_s8 + $0x78] sm:$0xff] %vm1586_vm11, %v1681_v62  ;;  %v1506_v21 = vpop.f32.mrf.mxu1 }
 0x35f   : > { %1570 = vst.msk [vmem:[%s3154_s27 + $0x80] sm:$0xff] %vm357_vm1, %v1506_v21  ;;  %v1780_v34 = vsub.f32 %v1506_v21, %v2206_v58 }
 0x361   : > { %v1812_v13 = vmul.f32 %v1780_v34, %v1780_v34 }
 0x363   : > { %v1859_v59 = vsel %vm357_vm1, %v1812_v13, 0.0  ;;  %v2213_v13 = vld [vmem:[%s2291_s9 + $0xc0] sm:$0xff] }
 0x364   : > { %v1860_v61 = vadd.f32 %v1859_v59, %v1858_v26  ;;  %v3533_v52 = vpop.f32.mrf.mxu3  ;;  %v2212_v26 = vld [vmem:[%s2291_s9 + $0xb0] sm:$0xff]  ;;  %v1788_v59 = vsub.f32 %v3469_v55, %v2213_v13 }
 0x365   : > { %1582 = vst.msk [vmem:[%s3154_s27 + $0xe0] sm:$0xff] %vm357_vm1, %v3533_v52  ;;  %v1684_v56 = vpop.f32.mrf.mxu2 }
 0x366   : > { %1748 = vst.msk [vmem:[%s3169_s8 + $0x80] sm:$0xff] %vm1586_vm11, %v1684_v56  ;;  %v1509_v5 = vpop.f32.mrf.mxu1  ;;  %v1820_v60 = vmul.f32 %v1788_v59, %v1788_v59 }
 0x367   : > { %1571 = vst.msk [vmem:[%s3154_s27 + $0x88] sm:$0xff] %vm357_vm1, %v1509_v5  ;;  %v1781_v1 = vsub.f32 %v1509_v5, %v2207_v36  ;;  %v2214_v36 = vld [vmem:[%s2291_s9 + $0xc8] sm:$0xff] }
 0x369   : > { %v1813_v31 = vmul.f32 %v1781_v1, %v1781_v1  ;;  %v1789_v1 = vsub.f32 %v3490_v38, %v2214_v36 }
 0x36b   : > { %v1861_v27 = vsel %vm357_vm1, %v1813_v31, 0.0 }
 0x36c   : > { %v1862_v29 = vadd.f32 %v1861_v27, %v1860_v61  ;;  %v2215_v27 = vld [vmem:[%s2291_s9 + $0xb8] sm:$0xff] }
 0x36d   : > { %v1687_v23 = vpop.f32.mrf.mxu2 }
 0x36e   : > { %1749 = vst.msk [vmem:[%s3169_s8 + $0x88] sm:$0xff] %vm1586_vm11, %v1687_v23 }
 0x373   : > { %v1121_v9 = vpop.xlane.xlu2 %1120 }
 0x374   : > { %v1122_v11 = vcvt.f32.s32 %v1121_v9  ;;  %v2216_v9 = vld [vmem:[%s2291_s9 + $0xd0] sm:$0xff] }
 0x375   : > { %v1790_v55 = vsub.f32 %v3510_v18, %v2216_v9 }
 0x376   : > { %v1125_v2 = vadd.s32 %v1124_v35, %v1122_v11 }
 0x378   : > { %1610 = vst.msk [vmem:[%s2909_s22 + $0xb8] sm:$0xff] %vm1586_vm11, %v1125_v2  ;;  %vm1269_vm5 = vcmp.eq.s32.totalorder %v2466_v30, %v1125_v2  ;;  %v1821_v2 = vmul.f32 %v1789_v1, %v1789_v1 }
 0x379   : > { %v1336_v28 = vsel %vm1269_vm5, %v1304_v3, 0.0  ;;  %v2217_v3 = vld [vmem:[%s2291_s9 + $0xd8] sm:$0xff] }
 0x37a   : > { %2127 = vmatmul.msk.f32.gmra.mxu1 %vm605_vm2, %v1336_v28  ;;  %v3553_v48 = vpop.f32.mrf.mxu3  ;;  %2159 = vmatmul.msk.f32.gmra.mxu2 %vm605_vm2, %v1336_v28  ;;  %v1791_v38 = vsub.f32 %v3522_v45, %v2217_v3 }
 0x37b   : > { %1583 = vst.msk [vmem:[%s3154_s27 + $0xe8] sm:$0xff] %vm357_vm1, %v3553_v48 }
 0x382   : > { %v3559_v20 = vpop.f32.mrf.mxu3 }
 0x383   : > { %1584 = vst.msk [vmem:[%s3154_s27 + $0xf0] sm:$0xff] %vm357_vm1, %v3559_v20 }
 0x384   : > { %v1512_v30 = vpop.f32.mrf.mxu1 }
 0x385   : > { %1572 = vst.msk [vmem:[%s3154_s27 + $0x90] sm:$0xff] %vm357_vm1, %v1512_v30  ;;  %v1782_v50 = vsub.f32 %v1512_v30, %v2208_v47 }
 0x387   : > { %v1814_v46 = vmul.f32 %v1782_v50, %v1782_v50  ;;  %v1875_v50 = vsel %vm357_vm1, %v1820_v60, 0.0 }
 0x389   : > { %v1863_v0 = vsel %vm357_vm1, %v1814_v46, 0.0  ;;  %v1822_v46 = vmul.f32 %v1790_v55, %v1790_v55 }
 0x38a   : > { %v1864_v6 = vadd.f32 %v1863_v0, %v1862_v29  ;;  %v1690_v33 = vpop.f32.mrf.mxu2  ;;  %v2218_v0 = vld [vmem:[%s2291_s9 + $0xe0] sm:$0xff] }
 0x38b   : > { %1750 = vst.msk [vmem:[%s3169_s8 + $0x90] sm:$0xff] %vm1586_vm11, %v1690_v33  ;;  %v1877_v33 = vsel %vm357_vm1, %v1821_v2, 0.0 }
 0x392   : > { %v3570_v32 = vpop.f32.mrf.mxu3 }
 0x393   : > { %1585 = vst.msk [vmem:[%s3154_s27 + $0xf8] sm:$0xff] %vm357_vm1, %v3570_v32 }
 0x39a   : > { %v1708_v40 = vpop.f32.mrf.mxu3 }
 0x39b   : > { %1756 = vst.msk [vmem:[%s3169_s8 + $0xc0] sm:$0xff] %vm1586_vm11, %v1708_v40  ;;  %v1823_v40 = vmul.f32 %v1791_v38, %v1791_v38 }
 0x39c   : > { %v1515_v44 = vpop.f32.mrf.mxu1 }
 0x39d   : > { %1573 = vst.msk [vmem:[%s3154_s27 + $0x98] sm:$0xff] %vm357_vm1, %v1515_v44  ;;  %v1783_v37 = vsub.f32 %v1515_v44, %v2209_v63  ;;  %v2219_v44 = vld [vmem:[%s2291_s9 + $0xe8] sm:$0xff] }
 0x39e   : > { %v1793_v45 = vsub.f32 %v3553_v48, %v2219_v44 }
 0x39f   : > { %v1815_v19 = vmul.f32 %v1783_v37, %v1783_v37  ;;  %v1879_v37 = vsel %vm357_vm1, %v1822_v46, 0.0 }
 0x3a1   : > { %v1865_v7 = vsel %vm357_vm1, %v1815_v19, 0.0 }
 0x3a2   : > { %v1866_v14 = vadd.f32 %v1865_v7, %v1864_v6  ;;  %v1693_v53 = vpop.f32.mrf.mxu2  ;;  %v1792_v6 = vsub.f32 %v3533_v52, %v2218_v0  ;;  %v2220_v7 = vld [vmem:[%s2291_s9 + $0xf0] sm:$0xff]  ;;  %v1881_v52 = vsel %vm357_vm1, %v1823_v40, 0.0 }
 0x3a3   : > { %1751 = vst.msk [vmem:[%s3169_s8 + $0x98] sm:$0xff] %vm1586_vm11, %v1693_v53  ;;  %v1711_v41 = vpop.f32.mrf.mxu3 }
 0x3a4   : > { %1757 = vst.msk [vmem:[%s3169_s8 + $0xc8] sm:$0xff] %vm1586_vm11, %v1711_v41  ;;  %v1824_v19 = vmul.f32 %v1792_v6, %v1792_v6  ;;  %v1825_v41 = vmul.f32 %v1793_v45, %v1793_v45 }
 0x3ab   : > { %v1714_v43 = vpop.f32.mrf.mxu3 }
 0x3ac   : > { %1758 = vst.msk [vmem:[%s3169_s8 + $0xd0] sm:$0xff] %vm1586_vm11, %v1714_v43  ;;  %v2221_v43 = vld [vmem:[%s2291_s9 + $0xf8] sm:$0xff]  ;;  %s2070_s9 = sshll.u32 %s3780_s25, 3 }
 0x3ad   : > { %s318_s13 = scalar_lea.vmem %s3662_s7, %s2070_s9 }
 0x3b3   : > { %v1717_v8 = vpop.f32.mrf.mxu3 }
 0x3b4   : > { %1759 = vst.msk [vmem:[%s3169_s8 + $0xd8] sm:$0xff] %vm1586_vm11, %v1717_v8  ;;  %v1795_v8 = vsub.f32 %v3570_v32, %v2221_v43 }
 0x3bb   : > { %v1720_v17 = vpop.f32.mrf.mxu3 }
 0x3bc   : > { %1760 = vst.msk [vmem:[%s3169_s8 + $0xe0] sm:$0xff] %vm1586_vm11, %v1720_v17 }
 0x3c1   : > { %v1518_v57 = vpop.f32.mrf.mxu1 }
 0x3c2   : > { %1574 = vst.msk [vmem:[%s3154_s27 + $0xa0] sm:$0xff] %vm357_vm1, %v1518_v57  ;;  %v1784_v49 = vsub.f32 %v1518_v57, %v2210_v4  ;;  %v1883_v57 = vsel %vm357_vm1, %v1824_v19, 0.0 }
 0x3c3   : > { %v1723_v12 = vpop.f32.mrf.mxu3 }
 0x3c4   : > { %1761 = vst.msk [vmem:[%s3169_s8 + $0xe8] sm:$0xff] %vm1586_vm11, %v1723_v12  ;;  %v1816_v22 = vmul.f32 %v1784_v49, %v1784_v49  ;;  %v3776_v49 = vlaneseq }
 0x3c6   : > { %v1867_v58 = vsel %vm357_vm1, %v1816_v22, 0.0 }
 0x3c7   : > { %v1696_v51 = vpop.f32.mrf.mxu2  ;;  %v1868_v56 = vadd.f32 %v1867_v58, %v1866_v14  ;;  %v1794_v14 = vsub.f32 %v3559_v20, %v2220_v7 }
 0x3c8   : > { %1752 = vst.msk [vmem:[%s3169_s8 + $0xa0] sm:$0xff] %vm1586_vm11, %v1696_v51  ;;  %v1885_v51 = vsel %vm357_vm1, %v1825_v41, 0.0 }
 0x3c9   : > { %v1521_v54 = vpop.f32.mrf.mxu1  ;;  %v1826_v48 = vmul.f32 %v1794_v14, %v1794_v14 }
 0x3ca   : > { %1575 = vst.msk [vmem:[%s3154_s27 + $0xa8] sm:$0xff] %vm357_vm1, %v1521_v54  ;;  %v1785_v15 = vsub.f32 %v1521_v54, %v2211_v39  ;;  %v1827_v54 = vmul.f32 %v1795_v8, %v1795_v8  ;;  %v1898_v39 = vshrl.u32 %v3776_v49, 7 }
 0x3cb   : > { %v1726_v42 = vpop.f32.mrf.mxu3  ;;  %v1887_v20 = vsel %vm357_vm1, %v1826_v48, 0.0 }
 0x3cc   : > { %1762 = vst.msk [vmem:[%s3169_s8 + $0xf0] sm:$0xff] %vm1586_vm11, %v1726_v42  ;;  %v1817_v21 = vmul.f32 %v1785_v15, %v1785_v15  ;;  %vm1899_vm2 = vcmp.eq.s32.totalorder %v1898_v39, 0 }
 0x3ce   : > { %v1869_v61 = vsel %vm357_vm1, %v1817_v21, 0.0 }
 0x3cf   : > { %v1699_v16 = vpop.f32.mrf.mxu2  ;;  %v1870_v23 = vadd.f32 %v1869_v61, %v1868_v56 }
 0x3d0   : > { %1753 = vst.msk [vmem:[%s3169_s8 + $0xa8] sm:$0xff] %vm1586_vm11, %v1699_v16 }
 0x3d1   : > { %v1524_v25 = vpop.f32.mrf.mxu1 }
 0x3d2   : > { %1576 = vst.msk [vmem:[%s3154_s27 + $0xb0] sm:$0xff] %vm357_vm1, %v1524_v25  ;;  %v1786_v62 = vsub.f32 %v1524_v25, %v2212_v26  ;;  %v1889_v25 = vsel %vm357_vm1, %v1827_v54, 0.0 }
 0x3d3   : > { %v1729_v10 = vpop.f32.mrf.mxu3 }
 0x3d4   : > { %1763 = vst.msk [vmem:[%s3169_s8 + $0xf8] sm:$0xff] %vm1586_vm11, %v1729_v10  ;;  %v1818_v34 = vmul.f32 %v1786_v62, %v1786_v62 }
 0x3d6   : > { %v1871_v31 = vsel %vm357_vm1, %v1818_v34, 0.0 }
 0x3d7   : > { %v1702_v24 = vpop.f32.mrf.mxu2  ;;  %v1872_v11 = vadd.f32 %v1871_v31, %v1870_v23 }
 0x3d8   : > { %1754 = vst.msk [vmem:[%s3169_s8 + $0xb0] sm:$0xff] %vm1586_vm11, %v1702_v24 }
 0x3f7   : > { %v1527_v5 = vpop.f32.mrf.mxu1 }
 0x3f8   : > { %1577 = vst.msk [vmem:[%s3154_s27 + $0xb8] sm:$0xff] %vm357_vm1, %v1527_v5  ;;  %v1787_v29 = vsub.f32 %v1527_v5, %v2215_v27 }
 0x3fa   : > { %v1819_v35 = vmul.f32 %v1787_v29, %v1787_v29 }
 0x3fc   : > { %v1873_v28 = vsel %vm357_vm1, %v1819_v35, 0.0 }
 0x3fd   : > { %v1874_v30 = vadd.f32 %v1873_v28, %v1872_v11  ;;  %v1705_v47 = vpop.f32.mrf.mxu2 }
 0x3fe   : > { %1755 = vst.msk [vmem:[%s3169_s8 + $0xb8] sm:$0xff] %vm1586_vm11, %v1705_v47 }
 0x3ff   : > { %v1876_v18 = vadd.f32 %v1875_v50, %v1874_v30 }
 0x401   : > { %v1878_v63 = vadd.f32 %v1877_v33, %v1876_v18 }
 0x403   : > { %v1880_v53 = vadd.f32 %v1879_v37, %v1878_v63 }
 0x405   : > { %v1882_v17 = vadd.f32 %v1881_v52, %v1880_v53 }
 0x407   : > { %v1884_v12 = vadd.f32 %v1883_v57, %v1882_v17 }
 0x409   : > { %v1886_v42 = vadd.f32 %v1885_v51, %v1884_v12 }
 0x40b   : > { %v1888_v16 = vadd.f32 %v1887_v20, %v1886_v42 }
 0x40d   : > { %v1890_v10 = vadd.f32 %v1889_v25, %v1888_v16 }
 0x40f   : > { %v1891_v24 = vrot.slane %v1890_v10, 4 }
 0x411   : > { %v1892_v4 = vadd.f32 %v1891_v24, %v1890_v10 }
 0x413   : > { %v1893_v32 = vrot.slane %v1892_v4, 2 }
 0x415   : > { %v1894_v15 = vadd.f32 %v1893_v32, %v1892_v4 }
 0x417   : > { %v1895_v22 = vrot.slane %v1894_v15, 1 }
 0x419   : > { %v1896_v26 = vadd.f32 %v1895_v22, %v1894_v15 }
 0x41b   : > { %v1900_v62 = vsel %vm1899_vm2, %v1896_v26, 0.0 }
 0x41c   : > { %1901 = vst.msk [vmem:[%s318_s13] sm:$0xff] %vm357_vm1, %v1900_v62 }
 0x41d PF: > { %s18_s24 = sadd.s32 1, %s2228_s24  }
 0x41e   : > { %p15_p5 = scmp.ge.s32.totalorder %s18_s24, 4  }
 0x420   :  { %17 = sbr.rel (!%p15_p5) target bundleno = 1 (0x1), region = 102 }

</bundles_post_ra>
